<compile_context>
chip_gen: v7x
topology: tpu7x:2x2x1
jax: 0.10.0
libtpu: 0.0.40
codegen_flags: <defaults>
</compile_context>

<pallas_src>
import functools

import jax
import jax.numpy as jnp
from jax.experimental import pallas as pl
from jax.experimental.pallas import tpu as pltpu


def _yolo_decode_kernel(anchor_ref, pred_ref, gxy_ref, out_ref, *,
                        ba_tile, attrs, attrs_pad, hw, stride_w, stride_h):
    """Decode `ba_tile` (batch, anchor) slabs per grid step.

    anchor_ref : SMEM (bs*A, 2)   raw anchors (a_w, a_h), tiled per batch
    pred_ref   : VMEM (ba_tile, attrs, HW)   lane-dense predictions
    gxy_ref    : VMEM (2, HW)     row0 = grid_x*stride_w, row1 = grid_y*stride_h
    out_ref    : VMEM (ba_tile, HW, attrs)
    """
    base = pl.program_id(0) * ba_tile

    # Hoisted, lane-dense grid offsets (already scaled by stride).
    gx = gxy_ref[0:1, :]                       # (1, HW)
    gy = gxy_ref[1:2, :]                       # (1, HW)

    pad_rows = attrs_pad - attrs
    zero_pad = (jnp.zeros((pad_rows, hw), jnp.float32) if pad_rows else None)

    for i in range(ba_tile):                   # small static unroll
        g = base + i                           # global (b, a) index
        aw = anchor_ref[g, 0]                  # raw anchor width  (scalar, SMEM)
        ah = anchor_ref[g, 1]                  # raw anchor height

        p = pred_ref[i]                        # (attrs, HW), lane-dense
        sig = jax.nn.sigmoid(p)                # full-tile EUP (2/attrs rows wasted)
        ex = jnp.exp(p[2:4, :])                # exp only on the w/h rows

        bx = sig[0:1, :] * stride_w + gx       # (sigmoid(tx) + grid_x) * stride_w
        by = sig[1:2, :] * stride_h + gy
        bw = ex[0:1, :] * aw                   # exp(tw) * anchor_w  (stride folded)
        bh = ex[1:2, :] * ah

        pieces = [bx, by, bw, bh, sig[4:attrs, :]]
        if pad_rows:
            pieces.append(zero_pad)
        slab = jnp.concatenate(pieces, axis=0)     # (attrs_pad, HW), sublane concat

        # Fused permute: XLU transpose of an (attrs_pad, HW) 8/128-aligned slab,
        # then drop the padded rows when storing.
        out_ref[i] = slab.T[:, :attrs]             # (HW, attrs)


def yolo_decode_pallas(x, anchors, num_classes, img_size, *,
                       target_block_bytes=2 * 1024 * 1024):
    """Pallas implementation of YOLOLoss.forward(input, targets=None)."""
    bs, c, in_h, in_w = x.shape
    num_anchors = anchors.shape[0]
    attrs = 5 + num_classes
    assert c == num_anchors * attrs
    hw = in_h * in_w

    stride_h = float(img_size[1]) / in_h
    stride_w = float(img_size[0]) / in_w

    # FREE reshape of the NCHW conv output: (bs, A*attrs, H, W) -> (bs*A, attrs, HW).
    pred = x.reshape(bs * num_anchors, attrs, hw).astype(jnp.float32)

    # Lane-dense grid offsets, pre-scaled by stride.
    jj, ii = jnp.meshgrid(jnp.arange(in_h, dtype=jnp.float32),
                          jnp.arange(in_w, dtype=jnp.float32), indexing="ij")
    gxy = jnp.stack([ii.reshape(-1) * stride_w,
                     jj.reshape(-1) * stride_h], axis=0)          # (2, HW)

    # Raw anchors per (b, a): exp(tw) * (a/stride) * stride == exp(tw) * a.
    anchor_flat = jnp.tile(anchors.astype(jnp.float32), (bs, 1))  # (bs*A, 2)

    # Collapse (bs, A) into one axis; pick the largest divisor whose block stays
    # under the target size (amortizes the ~0.35 us per-grid-step overhead).
    ba_total = bs * num_anchors
    bytes_per_ba = attrs * hw * 4
    ba_tile = 1
    for d in range(ba_total, 0, -1):
        if ba_total % d == 0 and d * bytes_per_ba <= target_block_bytes:
            ba_tile = d
            break
    grid = (ba_total // ba_tile,)

    attrs_pad = ((attrs + 7) // 8) * 8

    kernel = functools.partial(
        _yolo_decode_kernel, ba_tile=ba_tile, attrs=attrs, attrs_pad=attrs_pad,
        hw=hw, stride_w=stride_w, stride_h=stride_h)

    out = pl.pallas_call(
        kernel,
        out_shape=jax.ShapeDtypeStruct((ba_total, hw, attrs), jnp.float32),
        grid=grid,
        in_specs=[
            pl.BlockSpec(memory_space=pltpu.MemorySpace.SMEM),            # anchors
            pl.BlockSpec((ba_tile, attrs, hw), lambda i: (i, 0, 0)),      # pred
            pl.BlockSpec((2, hw), lambda i: (0, 0)),                      # grid
        ],
        out_specs=pl.BlockSpec((ba_tile, hw, attrs), lambda i: (i, 0, 0)),
        compiler_params=pltpu.CompilerParams(
            dimension_semantics=("parallel",)),
    )(anchor_flat, pred, gxy)

    # (bs*A, HW, attrs) -> (bs, A*HW, attrs): free reshape, matches torch output.
    return out.reshape(bs, num_anchors * hw, attrs)


def yolo_decode_ref(x, anchors, num_classes, img_size):
    """Pure-JAX reference mirroring the torch targets=None branch."""
    bs, c, in_h, in_w = x.shape
    num_anchors = anchors.shape[0]
    bbox_attrs = 5 + num_classes
    stride_h = float(img_size[1]) / in_h
    stride_w = float(img_size[0]) / in_w

    pred = (x.reshape(bs, num_anchors, bbox_attrs, in_h, in_w)
              .transpose(0, 1, 3, 4, 2).astype(jnp.float32))  # (bs, A, H, W, attrs)
    px = jax.nn.sigmoid(pred[..., 0])
    py = jax.nn.sigmoid(pred[..., 1])
    pw = pred[..., 2]
    ph = pred[..., 3]
    conf = jax.nn.sigmoid(pred[..., 4])
    pcls = jax.nn.sigmoid(pred[..., 5:])

    scaled_anchors = (anchors.astype(jnp.float32)
                      / jnp.array([stride_w, stride_h], dtype=jnp.float32))
    grid_x = jnp.broadcast_to(jnp.arange(in_w, dtype=jnp.float32)[None, None, None, :],
                              px.shape)
    grid_y = jnp.broadcast_to(jnp.arange(in_h, dtype=jnp.float32)[None, None, :, None],
                              py.shape)
    aw = scaled_anchors[:, 0][None, :, None, None]
    ah = scaled_anchors[:, 1][None, :, None, None]

    boxes = jnp.stack([px + grid_x, py + grid_y,
                       jnp.exp(pw) * aw, jnp.exp(ph) * ah], axis=-1)
    scale = jnp.array([stride_w, stride_h, stride_w, stride_h], dtype=jnp.float32)
    return jnp.concatenate(
        [boxes.reshape(bs, -1, 4) * scale,
         conf.reshape(bs, -1, 1),
         pcls.reshape(bs, -1, num_classes)], axis=-1)


if __name__ == "__main__":
    # Small synthetic config consistent with the module.
    bs = 2
    num_anchors = 3
    num_classes = 4
    in_h = in_w = 16
    img_size = (128, 128)
    anchors = jnp.array([[10.0, 13.0], [16.0, 30.0], [33.0, 23.0]],
                        dtype=jnp.float32)

    key = jax.random.PRNGKey(0)
    x = jax.random.normal(
        key, (bs, num_anchors * (5 + num_classes), in_h, in_w), dtype=jnp.float32)

    out = yolo_decode_pallas(x, anchors, num_classes, img_size)
    out = jax.block_until_ready(out)

    ref = yolo_decode_ref(x, anchors, num_classes, img_size)
    assert out.shape == (bs, num_anchors * in_h * in_w, 5 + num_classes)
    assert jnp.allclose(out, ref, atol=1e-3, rtol=1e-4)

    print("KERNEL_OK")
</pallas_src>

<mosaic_0001>
module attributes {stable_mosaic.version = 11 : i64} {
  func.func @_yolo_decode_kernel(%arg0: i32, %arg1: memref<6x2xf32, #tpu.memory_space<smem>>, %arg2: memref<6x9x256xf32, #tpu.memory_space<vmem>>, %arg3: memref<2x256xf32, #tpu.memory_space<vmem>>, %arg4: memref<6x256x9xf32, #tpu.memory_space<vmem>>) attributes {dimension_semantics = [#tpu.dimension_semantics<parallel>], iteration_bounds = array<i64: 1>, scalar_prefetch = 0 : i64, scratch_operands = 0 : i64, tpu.core_type = #tpu.core_type<tc>, window_params = [{transform_indices = @transform_0, window_bounds = array<i64: 6, 2>}, {transform_indices = @transform_1, window_bounds = array<i64: 6, 9, 256>}, {pipeline_mode = #tpu.pipeline_mode<synchronous>, transform_indices = @transform_2, window_bounds = array<i64: 2, 256>}, {transform_indices = @transform_3, window_bounds = array<i64: 6, 256, 9>}]} {
    %c6_i32 = arith.constant 6 : i32
    %0 = arith.muli %arg0, %c6_i32 : i32
    %c0 = arith.constant 0 : index
    %c0_0 = arith.constant 0 : index
    %1 = vector.load %arg3[%c0, %c0_0] : memref<2x256xf32, #tpu.memory_space<vmem>>, vector<1x256xf32>
    %c1 = arith.constant 1 : index
    %c0_1 = arith.constant 0 : index
    %2 = vector.load %arg3[%c1, %c0_1] : memref<2x256xf32, #tpu.memory_space<vmem>>, vector<1x256xf32>
    %cst = arith.constant 0.000000e+00 : f32
    %3 = vector.broadcast %cst : f32 to vector<7x256xf32>
    %c0_i32 = arith.constant 0 : i32
    %4 = arith.addi %0, %c0_i32 : i32
    %5 = arith.index_cast %4 : i32 to index
    %c0_2 = arith.constant 0 : index
    %6 = memref.load %arg1[%5, %c0_2] : memref<6x2xf32, #tpu.memory_space<smem>>
    %7 = arith.index_cast %4 : i32 to index
    %c1_3 = arith.constant 1 : index
    %8 = memref.load %arg1[%7, %c1_3] : memref<6x2xf32, #tpu.memory_space<smem>>
    %c0_4 = arith.constant 0 : index
    %c0_5 = arith.constant 0 : index
    %c0_6 = arith.constant 0 : index
    %9 = vector.load %arg2[%c0_4, %c0_5, %c0_6] : memref<6x9x256xf32, #tpu.memory_space<vmem>>, vector<1x9x256xf32>
    %10 = vector.shape_cast %9 : vector<1x9x256xf32> to vector<9x256xf32>
    %11 = arith.negf %10 : vector<9x256xf32>
    %12 = math.exp %11 : vector<9x256xf32>
    %cst_7 = arith.constant 1.000000e+00 : f32
    %13 = vector.broadcast %cst_7 : f32 to vector<9x256xf32>
    %14 = arith.addf %13, %12 : vector<9x256xf32>
    %15 = arith.divf %13, %14 : vector<9x256xf32>
    %16 = vector.extract_strided_slice %10 {offsets = [2, 0], sizes = [2, 256], strides = [1, 1]} : vector<9x256xf32> to vector<2x256xf32>
    %17 = math.exp %16 : vector<2x256xf32>
    %18 = vector.extract_strided_slice %15 {offsets = [0, 0], sizes = [1, 256], strides = [1, 1]} : vector<9x256xf32> to vector<1x256xf32>
    %cst_8 = arith.constant 8.000000e+00 : f32
    %19 = vector.broadcast %cst_8 : f32 to vector<1x256xf32>
    %20 = arith.mulf %18, %19 : vector<1x256xf32>
    %21 = arith.addf %20, %1 : vector<1x256xf32>
    %22 = vector.extract_strided_slice %15 {offsets = [1, 0], sizes = [1, 256], strides = [1, 1]} : vector<9x256xf32> to vector<1x256xf32>
    %cst_9 = arith.constant 8.000000e+00 : f32
    %23 = vector.broadcast %cst_9 : f32 to vector<1x256xf32>
    %24 = arith.mulf %22, %23 : vector<1x256xf32>
    %25 = arith.addf %24, %2 : vector<1x256xf32>
    %26 = vector.extract_strided_slice %17 {offsets = [0, 0], sizes = [1, 256], strides = [1, 1]} : vector<2x256xf32> to vector<1x256xf32>
    %27 = vector.broadcast %6 : f32 to vector<1x256xf32>
    %28 = arith.mulf %26, %27 : vector<1x256xf32>
    %29 = vector.extract_strided_slice %17 {offsets = [1, 0], sizes = [1, 256], strides = [1, 1]} : vector<2x256xf32> to vector<1x256xf32>
    %30 = vector.broadcast %8 : f32 to vector<1x256xf32>
    %31 = arith.mulf %29, %30 : vector<1x256xf32>
    %32 = vector.extract_strided_slice %15 {offsets = [4, 0], sizes = [5, 256], strides = [1, 1]} : vector<9x256xf32> to vector<5x256xf32>
    %33 = tpu.concatenate %21, %25, %28, %31, %32, %3 in 0 : vector<1x256xf32>, vector<1x256xf32>, vector<1x256xf32>, vector<1x256xf32>, vector<5x256xf32>, vector<7x256xf32> -> vector<16x256xf32>
    %34 = tpu.transpose %33, [1, 0] : vector<16x256xf32> -> vector<256x16xf32>
    %35 = vector.extract_strided_slice %34 {offsets = [0, 0], sizes = [256, 9], strides = [1, 1]} : vector<256x16xf32> to vector<256x9xf32>
    %c0_10 = arith.constant 0 : index
    %c0_11 = arith.constant 0 : index
    %c0_12 = arith.constant 0 : index
    %36 = vector.load %arg4[%c0_10, %c0_11, %c0_12] : memref<6x256x9xf32, #tpu.memory_space<vmem>>, vector<1x256x9xf32>
    %37 = vector.shape_cast %36 : vector<1x256x9xf32> to vector<256x9xf32>
    %38 = vector.shape_cast %35 : vector<256x9xf32> to vector<1x256x9xf32>
    tpu.vector_store %arg4[%c0_10, %c0_11, %c0_12], %38 {strides = array<i32>} : memref<6x256x9xf32, #tpu.memory_space<vmem>>, vector<1x256x9xf32>,
    %c1_i32 = arith.constant 1 : i32
    %39 = arith.addi %0, %c1_i32 : i32
    %40 = arith.index_cast %39 : i32 to index
    %c0_13 = arith.constant 0 : index
    %41 = memref.load %arg1[%40, %c0_13] : memref<6x2xf32, #tpu.memory_space<smem>>
    %42 = arith.index_cast %39 : i32 to index
    %c1_14 = arith.constant 1 : index
    %43 = memref.load %arg1[%42, %c1_14] : memref<6x2xf32, #tpu.memory_space<smem>>
    %c1_15 = arith.constant 1 : index
    %c0_16 = arith.constant 0 : index
    %c0_17 = arith.constant 0 : index
    %44 = vector.load %arg2[%c1_15, %c0_16, %c0_17] : memref<6x9x256xf32, #tpu.memory_space<vmem>>, vector<1x9x256xf32>
    %45 = vector.shape_cast %44 : vector<1x9x256xf32> to vector<9x256xf32>
    %46 = arith.negf %45 : vector<9x256xf32>
    %47 = math.exp %46 : vector<9x256xf32>
    %cst_18 = arith.constant 1.000000e+00 : f32
    %48 = vector.broadcast %cst_18 : f32 to vector<9x256xf32>
    %49 = arith.addf %48, %47 : vector<9x256xf32>
    %50 = arith.divf %48, %49 : vector<9x256xf32>
    %51 = vector.extract_strided_slice %45 {offsets = [2, 0], sizes = [2, 256], strides = [1, 1]} : vector<9x256xf32> to vector<2x256xf32>
    %52 = math.exp %51 : vector<2x256xf32>
    %53 = vector.extract_strided_slice %50 {offsets = [0, 0], sizes = [1, 256], strides = [1, 1]} : vector<9x256xf32> to vector<1x256xf32>
    %cst_19 = arith.constant 8.000000e+00 : f32
    %54 = vector.broadcast %cst_19 : f32 to vector<1x256xf32>
    %55 = arith.mulf %53, %54 : vector<1x256xf32>
    %56 = arith.addf %55, %1 : vector<1x256xf32>
    %57 = vector.extract_strided_slice %50 {offsets = [1, 0], sizes = [1, 256], strides = [1, 1]} : vector<9x256xf32> to vector<1x256xf32>
    %cst_20 = arith.constant 8.000000e+00 : f32
    %58 = vector.broadcast %cst_20 : f32 to vector<1x256xf32>
    %59 = arith.mulf %57, %58 : vector<1x256xf32>
    %60 = arith.addf %59, %2 : vector<1x256xf32>
    %61 = vector.extract_strided_slice %52 {offsets = [0, 0], sizes = [1, 256], strides = [1, 1]} : vector<2x256xf32> to vector<1x256xf32>
    %62 = vector.broadcast %41 : f32 to vector<1x256xf32>
    %63 = arith.mulf %61, %62 : vector<1x256xf32>
    %64 = vector.extract_strided_slice %52 {offsets = [1, 0], sizes = [1, 256], strides = [1, 1]} : vector<2x256xf32> to vector<1x256xf32>
    %65 = vector.broadcast %43 : f32 to vector<1x256xf32>
    %66 = arith.mulf %64, %65 : vector<1x256xf32>
    %67 = vector.extract_strided_slice %50 {offsets = [4, 0], sizes = [5, 256], strides = [1, 1]} : vector<9x256xf32> to vector<5x256xf32>
    %68 = tpu.concatenate %56, %60, %63, %66, %67, %3 in 0 : vector<1x256xf32>, vector<1x256xf32>, vector<1x256xf32>, vector<1x256xf32>, vector<5x256xf32>, vector<7x256xf32> -> vector<16x256xf32>
    %69 = tpu.transpose %68, [1, 0] : vector<16x256xf32> -> vector<256x16xf32>
    %70 = vector.extract_strided_slice %69 {offsets = [0, 0], sizes = [256, 9], strides = [1, 1]} : vector<256x16xf32> to vector<256x9xf32>
    %c1_21 = arith.constant 1 : index
    %c0_22 = arith.constant 0 : index
    %c0_23 = arith.constant 0 : index
    %71 = vector.load %arg4[%c1_21, %c0_22, %c0_23] : memref<6x256x9xf32, #tpu.memory_space<vmem>>, vector<1x256x9xf32>
    %72 = vector.shape_cast %71 : vector<1x256x9xf32> to vector<256x9xf32>
    %73 = vector.shape_cast %70 : vector<256x9xf32> to vector<1x256x9xf32>
    tpu.vector_store %arg4[%c1_21, %c0_22, %c0_23], %73 {strides = array<i32>} : memref<6x256x9xf32, #tpu.memory_space<vmem>>, vector<1x256x9xf32>,
    %c2_i32 = arith.constant 2 : i32
    %74 = arith.addi %0, %c2_i32 : i32
    %75 = arith.index_cast %74 : i32 to index
    %c0_24 = arith.constant 0 : index
    %76 = memref.load %arg1[%75, %c0_24] : memref<6x2xf32, #tpu.memory_space<smem>>
    %77 = arith.index_cast %74 : i32 to index
    %c1_25 = arith.constant 1 : index
    %78 = memref.load %arg1[%77, %c1_25] : memref<6x2xf32, #tpu.memory_space<smem>>
    %c2 = arith.constant 2 : index
    %c0_26 = arith.constant 0 : index
    %c0_27 = arith.constant 0 : index
    %79 = vector.load %arg2[%c2, %c0_26, %c0_27] : memref<6x9x256xf32, #tpu.memory_space<vmem>>, vector<1x9x256xf32>
    %80 = vector.shape_cast %79 : vector<1x9x256xf32> to vector<9x256xf32>
    %81 = arith.negf %80 : vector<9x256xf32>
    %82 = math.exp %81 : vector<9x256xf32>
    %cst_28 = arith.constant 1.000000e+00 : f32
    %83 = vector.broadcast %cst_28 : f32 to vector<9x256xf32>
    %84 = arith.addf %83, %82 : vector<9x256xf32>
    %85 = arith.divf %83, %84 : vector<9x256xf32>
    %86 = vector.extract_strided_slice %80 {offsets = [2, 0], sizes = [2, 256], strides = [1, 1]} : vector<9x256xf32> to vector<2x256xf32>
    %87 = math.exp %86 : vector<2x256xf32>
    %88 = vector.extract_strided_slice %85 {offsets = [0, 0], sizes = [1, 256], strides = [1, 1]} : vector<9x256xf32> to vector<1x256xf32>
    %cst_29 = arith.constant 8.000000e+00 : f32
    %89 = vector.broadcast %cst_29 : f32 to vector<1x256xf32>
    %90 = arith.mulf %88, %89 : vector<1x256xf32>
    %91 = arith.addf %90, %1 : vector<1x256xf32>
    %92 = vector.extract_strided_slice %85 {offsets = [1, 0], sizes = [1, 256], strides = [1, 1]} : vector<9x256xf32> to vector<1x256xf32>
    %cst_30 = arith.constant 8.000000e+00 : f32
    %93 = vector.broadcast %cst_30 : f32 to vector<1x256xf32>
    %94 = arith.mulf %92, %93 : vector<1x256xf32>
    %95 = arith.addf %94, %2 : vector<1x256xf32>
    %96 = vector.extract_strided_slice %87 {offsets = [0, 0], sizes = [1, 256], strides = [1, 1]} : vector<2x256xf32> to vector<1x256xf32>
    %97 = vector.broadcast %76 : f32 to vector<1x256xf32>
    %98 = arith.mulf %96, %97 : vector<1x256xf32>
    %99 = vector.extract_strided_slice %87 {offsets = [1, 0], sizes = [1, 256], strides = [1, 1]} : vector<2x256xf32> to vector<1x256xf32>
    %100 = vector.broadcast %78 : f32 to vector<1x256xf32>
    %101 = arith.mulf %99, %100 : vector<1x256xf32>
    %102 = vector.extract_strided_slice %85 {offsets = [4, 0], sizes = [5, 256], strides = [1, 1]} : vector<9x256xf32> to vector<5x256xf32>
    %103 = tpu.concatenate %91, %95, %98, %101, %102, %3 in 0 : vector<1x256xf32>, vector<1x256xf32>, vector<1x256xf32>, vector<1x256xf32>, vector<5x256xf32>, vector<7x256xf32> -> vector<16x256xf32>
    %104 = tpu.transpose %103, [1, 0] : vector<16x256xf32> -> vector<256x16xf32>
    %105 = vector.extract_strided_slice %104 {offsets = [0, 0], sizes = [256, 9], strides = [1, 1]} : vector<256x16xf32> to vector<256x9xf32>
    %c2_31 = arith.constant 2 : index
    %c0_32 = arith.constant 0 : index
    %c0_33 = arith.constant 0 : index
    %106 = vector.load %arg4[%c2_31, %c0_32, %c0_33] : memref<6x256x9xf32, #tpu.memory_space<vmem>>, vector<1x256x9xf32>
    %107 = vector.shape_cast %106 : vector<1x256x9xf32> to vector<256x9xf32>
    %108 = vector.shape_cast %105 : vector<256x9xf32> to vector<1x256x9xf32>
    tpu.vector_store %arg4[%c2_31, %c0_32, %c0_33], %108 {strides = array<i32>} : memref<6x256x9xf32, #tpu.memory_space<vmem>>, vector<1x256x9xf32>,
    %c3_i32 = arith.constant 3 : i32
    %109 = arith.addi %0, %c3_i32 : i32
    %110 = arith.index_cast %109 : i32 to index
    %c0_34 = arith.constant 0 : index
    %111 = memref.load %arg1[%110, %c0_34] : memref<6x2xf32, #tpu.memory_space<smem>>
    %112 = arith.index_cast %109 : i32 to index
    %c1_35 = arith.constant 1 : index
    %113 = memref.load %arg1[%112, %c1_35] : memref<6x2xf32, #tpu.memory_space<smem>>
    %c3 = arith.constant 3 : index
    %c0_36 = arith.constant 0 : index
    %c0_37 = arith.constant 0 : index
    %114 = vector.load %arg2[%c3, %c0_36, %c0_37] : memref<6x9x256xf32, #tpu.memory_space<vmem>>, vector<1x9x256xf32>
    %115 = vector.shape_cast %114 : vector<1x9x256xf32> to vector<9x256xf32>
    %116 = arith.negf %115 : vector<9x256xf32>
    %117 = math.exp %116 : vector<9x256xf32>
    %cst_38 = arith.constant 1.000000e+00 : f32
    %118 = vector.broadcast %cst_38 : f32 to vector<9x256xf32>
    %119 = arith.addf %118, %117 : vector<9x256xf32>
    %120 = arith.divf %118, %119 : vector<9x256xf32>
    %121 = vector.extract_strided_slice %115 {offsets = [2, 0], sizes = [2, 256], strides = [1, 1]} : vector<9x256xf32> to vector<2x256xf32>
    %122 = math.exp %121 : vector<2x256xf32>
    %123 = vector.extract_strided_slice %120 {offsets = [0, 0], sizes = [1, 256], strides = [1, 1]} : vector<9x256xf32> to vector<1x256xf32>
    %cst_39 = arith.constant 8.000000e+00 : f32
    %124 = vector.broadcast %cst_39 : f32 to vector<1x256xf32>
    %125 = arith.mulf %123, %124 : vector<1x256xf32>
    %126 = arith.addf %125, %1 : vector<1x256xf32>
    %127 = vector.extract_strided_slice %120 {offsets = [1, 0], sizes = [1, 256], strides = [1, 1]} : vector<9x256xf32> to vector<1x256xf32>
    %cst_40 = arith.constant 8.000000e+00 : f32
    %128 = vector.broadcast %cst_40 : f32 to vector<1x256xf32>
    %129 = arith.mulf %127, %128 : vector<1x256xf32>
    %130 = arith.addf %129, %2 : vector<1x256xf32>
    %131 = vector.extract_strided_slice %122 {offsets = [0, 0], sizes = [1, 256], strides = [1, 1]} : vector<2x256xf32> to vector<1x256xf32>
    %132 = vector.broadcast %111 : f32 to vector<1x256xf32>
    %133 = arith.mulf %131, %132 : vector<1x256xf32>
    %134 = vector.extract_strided_slice %122 {offsets = [1, 0], sizes = [1, 256], strides = [1, 1]} : vector<2x256xf32> to vector<1x256xf32>
    %135 = vector.broadcast %113 : f32 to vector<1x256xf32>
    %136 = arith.mulf %134, %135 : vector<1x256xf32>
    %137 = vector.extract_strided_slice %120 {offsets = [4, 0], sizes = [5, 256], strides = [1, 1]} : vector<9x256xf32> to vector<5x256xf32>
    %138 = tpu.concatenate %126, %130, %133, %136, %137, %3 in 0 : vector<1x256xf32>, vector<1x256xf32>, vector<1x256xf32>, vector<1x256xf32>, vector<5x256xf32>, vector<7x256xf32> -> vector<16x256xf32>
    %139 = tpu.transpose %138, [1, 0] : vector<16x256xf32> -> vector<256x16xf32>
    %140 = vector.extract_strided_slice %139 {offsets = [0, 0], sizes = [256, 9], strides = [1, 1]} : vector<256x16xf32> to vector<256x9xf32>
    %c3_41 = arith.constant 3 : index
    %c0_42 = arith.constant 0 : index
    %c0_43 = arith.constant 0 : index
    %141 = vector.load %arg4[%c3_41, %c0_42, %c0_43] : memref<6x256x9xf32, #tpu.memory_space<vmem>>, vector<1x256x9xf32>
    %142 = vector.shape_cast %141 : vector<1x256x9xf32> to vector<256x9xf32>
    %143 = vector.shape_cast %140 : vector<256x9xf32> to vector<1x256x9xf32>
    tpu.vector_store %arg4[%c3_41, %c0_42, %c0_43], %143 {strides = array<i32>} : memref<6x256x9xf32, #tpu.memory_space<vmem>>, vector<1x256x9xf32>,
    %c4_i32 = arith.constant 4 : i32
    %144 = arith.addi %0, %c4_i32 : i32
    %145 = arith.index_cast %144 : i32 to index
    %c0_44 = arith.constant 0 : index
    %146 = memref.load %arg1[%145, %c0_44] : memref<6x2xf32, #tpu.memory_space<smem>>
    %147 = arith.index_cast %144 : i32 to index
    %c1_45 = arith.constant 1 : index
    %148 = memref.load %arg1[%147, %c1_45] : memref<6x2xf32, #tpu.memory_space<smem>>
    %c4 = arith.constant 4 : index
    %c0_46 = arith.constant 0 : index
    %c0_47 = arith.constant 0 : index
    %149 = vector.load %arg2[%c4, %c0_46, %c0_47] : memref<6x9x256xf32, #tpu.memory_space<vmem>>, vector<1x9x256xf32>
    %150 = vector.shape_cast %149 : vector<1x9x256xf32> to vector<9x256xf32>
    %151 = arith.negf %150 : vector<9x256xf32>
    %152 = math.exp %151 : vector<9x256xf32>
    %cst_48 = arith.constant 1.000000e+00 : f32
    %153 = vector.broadcast %cst_48 : f32 to vector<9x256xf32>
    %154 = arith.addf %153, %152 : vector<9x256xf32>
    %155 = arith.divf %153, %154 : vector<9x256xf32>
    %156 = vector.extract_strided_slice %150 {offsets = [2, 0], sizes = [2, 256], strides = [1, 1]} : vector<9x256xf32> to vector<2x256xf32>
    %157 = math.exp %156 : vector<2x256xf32>
    %158 = vector.extract_strided_slice %155 {offsets = [0, 0], sizes = [1, 256], strides = [1, 1]} : vector<9x256xf32> to vector<1x256xf32>
    %cst_49 = arith.constant 8.000000e+00 : f32
    %159 = vector.broadcast %cst_49 : f32 to vector<1x256xf32>
    %160 = arith.mulf %158, %159 : vector<1x256xf32>
    %161 = arith.addf %160, %1 : vector<1x256xf32>
    %162 = vector.extract_strided_slice %155 {offsets = [1, 0], sizes = [1, 256], strides = [1, 1]} : vector<9x256xf32> to vector<1x256xf32>
    %cst_50 = arith.constant 8.000000e+00 : f32
    %163 = vector.broadcast %cst_50 : f32 to vector<1x256xf32>
    %164 = arith.mulf %162, %163 : vector<1x256xf32>
    %165 = arith.addf %164, %2 : vector<1x256xf32>
    %166 = vector.extract_strided_slice %157 {offsets = [0, 0], sizes = [1, 256], strides = [1, 1]} : vector<2x256xf32> to vector<1x256xf32>
    %167 = vector.broadcast %146 : f32 to vector<1x256xf32>
    %168 = arith.mulf %166, %167 : vector<1x256xf32>
    %169 = vector.extract_strided_slice %157 {offsets = [1, 0], sizes = [1, 256], strides = [1, 1]} : vector<2x256xf32> to vector<1x256xf32>
    %170 = vector.broadcast %148 : f32 to vector<1x256xf32>
    %171 = arith.mulf %169, %170 : vector<1x256xf32>
    %172 = vector.extract_strided_slice %155 {offsets = [4, 0], sizes = [5, 256], strides = [1, 1]} : vector<9x256xf32> to vector<5x256xf32>
    %173 = tpu.concatenate %161, %165, %168, %171, %172, %3 in 0 : vector<1x256xf32>, vector<1x256xf32>, vector<1x256xf32>, vector<1x256xf32>, vector<5x256xf32>, vector<7x256xf32> -> vector<16x256xf32>
    %174 = tpu.transpose %173, [1, 0] : vector<16x256xf32> -> vector<256x16xf32>
    %175 = vector.extract_strided_slice %174 {offsets = [0, 0], sizes = [256, 9], strides = [1, 1]} : vector<256x16xf32> to vector<256x9xf32>
    %c4_51 = arith.constant 4 : index
    %c0_52 = arith.constant 0 : index
    %c0_53 = arith.constant 0 : index
    %176 = vector.load %arg4[%c4_51, %c0_52, %c0_53] : memref<6x256x9xf32, #tpu.memory_space<vmem>>, vector<1x256x9xf32>
    %177 = vector.shape_cast %176 : vector<1x256x9xf32> to vector<256x9xf32>
    %178 = vector.shape_cast %175 : vector<256x9xf32> to vector<1x256x9xf32>
    tpu.vector_store %arg4[%c4_51, %c0_52, %c0_53], %178 {strides = array<i32>} : memref<6x256x9xf32, #tpu.memory_space<vmem>>, vector<1x256x9xf32>,
    %c5_i32 = arith.constant 5 : i32
    %179 = arith.addi %0, %c5_i32 : i32
    %180 = arith.index_cast %179 : i32 to index
    %c0_54 = arith.constant 0 : index
    %181 = memref.load %arg1[%180, %c0_54] : memref<6x2xf32, #tpu.memory_space<smem>>
    %182 = arith.index_cast %179 : i32 to index
    %c1_55 = arith.constant 1 : index
    %183 = memref.load %arg1[%182, %c1_55] : memref<6x2xf32, #tpu.memory_space<smem>>
    %c5 = arith.constant 5 : index
    %c0_56 = arith.constant 0 : index
    %c0_57 = arith.constant 0 : index
    %184 = vector.load %arg2[%c5, %c0_56, %c0_57] : memref<6x9x256xf32, #tpu.memory_space<vmem>>, vector<1x9x256xf32>
    %185 = vector.shape_cast %184 : vector<1x9x256xf32> to vector<9x256xf32>
    %186 = arith.negf %185 : vector<9x256xf32>
    %187 = math.exp %186 : vector<9x256xf32>
    %cst_58 = arith.constant 1.000000e+00 : f32
    %188 = vector.broadcast %cst_58 : f32 to vector<9x256xf32>
    %189 = arith.addf %188, %187 : vector<9x256xf32>
    %190 = arith.divf %188, %189 : vector<9x256xf32>
    %191 = vector.extract_strided_slice %185 {offsets = [2, 0], sizes = [2, 256], strides = [1, 1]} : vector<9x256xf32> to vector<2x256xf32>
    %192 = math.exp %191 : vector<2x256xf32>
    %193 = vector.extract_strided_slice %190 {offsets = [0, 0], sizes = [1, 256], strides = [1, 1]} : vector<9x256xf32> to vector<1x256xf32>
    %cst_59 = arith.constant 8.000000e+00 : f32
    %194 = vector.broadcast %cst_59 : f32 to vector<1x256xf32>
    %195 = arith.mulf %193, %194 : vector<1x256xf32>
    %196 = arith.addf %195, %1 : vector<1x256xf32>
    %197 = vector.extract_strided_slice %190 {offsets = [1, 0], sizes = [1, 256], strides = [1, 1]} : vector<9x256xf32> to vector<1x256xf32>
    %cst_60 = arith.constant 8.000000e+00 : f32
    %198 = vector.broadcast %cst_60 : f32 to vector<1x256xf32>
    %199 = arith.mulf %197, %198 : vector<1x256xf32>
    %200 = arith.addf %199, %2 : vector<1x256xf32>
    %201 = vector.extract_strided_slice %192 {offsets = [0, 0], sizes = [1, 256], strides = [1, 1]} : vector<2x256xf32> to vector<1x256xf32>
    %202 = vector.broadcast %181 : f32 to vector<1x256xf32>
    %203 = arith.mulf %201, %202 : vector<1x256xf32>
    %204 = vector.extract_strided_slice %192 {offsets = [1, 0], sizes = [1, 256], strides = [1, 1]} : vector<2x256xf32> to vector<1x256xf32>
    %205 = vector.broadcast %183 : f32 to vector<1x256xf32>
    %206 = arith.mulf %204, %205 : vector<1x256xf32>
    %207 = vector.extract_strided_slice %190 {offsets = [4, 0], sizes = [5, 256], strides = [1, 1]} : vector<9x256xf32> to vector<5x256xf32>
    %208 = tpu.concatenate %196, %200, %203, %206, %207, %3 in 0 : vector<1x256xf32>, vector<1x256xf32>, vector<1x256xf32>, vector<1x256xf32>, vector<5x256xf32>, vector<7x256xf32> -> vector<16x256xf32>
    %209 = tpu.transpose %208, [1, 0] : vector<16x256xf32> -> vector<256x16xf32>
    %210 = vector.extract_strided_slice %209 {offsets = [0, 0], sizes = [256, 9], strides = [1, 1]} : vector<256x16xf32> to vector<256x9xf32>
    %c5_61 = arith.constant 5 : index
    %c0_62 = arith.constant 0 : index
    %c0_63 = arith.constant 0 : index
    %211 = vector.load %arg4[%c5_61, %c0_62, %c0_63] : memref<6x256x9xf32, #tpu.memory_space<vmem>>, vector<1x256x9xf32>
    %212 = vector.shape_cast %211 : vector<1x256x9xf32> to vector<256x9xf32>
    %213 = vector.shape_cast %210 : vector<256x9xf32> to vector<1x256x9xf32>
    tpu.vector_store %arg4[%c5_61, %c0_62, %c0_63], %213 {strides = array<i32>} : memref<6x256x9xf32, #tpu.memory_space<vmem>>, vector<1x256x9xf32>,
    return
  }
  func.func @transform_0(%arg0: i32) -> (i32, i32) {
    %c0_i32 = arith.constant 0 : i32
    %c0_i32_0 = arith.constant 0 : i32
    %c0_i32_1 = arith.constant 0 : i32
    return %c0_i32, %c0_i32_0 : i32, i32
  }
  func.func @transform_1(%arg0: i32) -> (i32, i32, i32) {
    %c0_i32 = arith.constant 0 : i32
    %c0_i32_0 = arith.constant 0 : i32
    %c0_i32_1 = arith.constant 0 : i32
    return %arg0, %c0_i32, %c0_i32_0 : i32, i32, i32
  }
  func.func @transform_2(%arg0: i32) -> (i32, i32) {
    %c0_i32 = arith.constant 0 : i32
    %c0_i32_0 = arith.constant 0 : i32
    %c0_i32_1 = arith.constant 0 : i32
    return %c0_i32, %c0_i32_0 : i32, i32
  }
  func.func @transform_3(%arg0: i32) -> (i32, i32, i32) {
    %c0_i32 = arith.constant 0 : i32
    %c0_i32_0 = arith.constant 0 : i32
    %c0_i32_1 = arith.constant 0 : i32
    return %arg0, %c0_i32, %c0_i32_0 : i32, i32, i32
  }
}

</mosaic_0001>

<bundles_post_ra>
// kernel: tpu_custom_call.1
= control target key start
LH: loop header
LB: loop body
LE: loop exit
PB: predicated region body
PF: predicated region fallthrough
CT: control target
= control target key end

     0   :  { %8 = vsyncpa [#allocation3], 0  ;;  %s2340_s0 = inlined_call_operand.vmem [shape: f32[6,2], index: 0, kind: input, shape index: {}]   ;;  %s2341_s1 = inlined_call_operand.vmem [shape: f32[6,9,256], index: 1, kind: input, shape index: {}]   ;;  %s2342_s2 = inlined_call_operand.vmem [shape: f32[2,256], index: 2, kind: input, shape index: {}]   ;;  %s2343_s3 = inlined_call_operand.vmem [shape: f32[6,256,9], index: 3, kind: output, shape index: {}]  }
   0x1   :  { %s15_s14 = sshll.u32 %s2340_s0, 4  ;;  %s16_s14 = int_to_ptr.vmem [resolvable:$true] %s15_s14 }
   0x2   :  { %s1340_s15 = scalar_lea.vmem %s16_s14, 128  ;;  %p1345_p1 = scmp.lt.s32.totalorder %s16_s14, %s16_s14 }
   0x3   :  { %p1341_p0 = scmp.ne.s32.totalorder %s16_s14, %s1340_s15  ;;  %p1346_p2 = scmp.lt.s32.totalorder %s1340_s15, %s1340_s15 }
   0x5   :  { %p1347_p3 = por %p1346_p2, %p1345_p1 }
   0x7   :  { %p1348_p4 = pnand %p1347_p3, %p1341_p0 }
   0x9   :  { %1351 = shalt.err (!%p1348_p4)
}
   0xa   :  { %s1354_s16 = smov [#allocation2]  }
   0xb   :  { %18 = dma.vmem_to_smem %s16_s14, 128, %s1354_s16, [#allocation3]  }
   0xc   :  { %1352 = dma.done.wait [#allocation3], 128  }
   0xd   :  { %1353 = vsyncadd [#allocation3], 4294967168 }
   0xe   :  { %26 = sfence }
   0xf   :  { %v36_v0 = vld [vmem:[%s2341_s1 + $0x8] sm:$0xff]  ;;  %v35_v2 = vld [vmem:[%s2341_s1] sm:$0xff]  ;;  %v38_v3 = vld [vmem:[%s2341_s1 + $0x18] sm:$0x1]  ;;  %v70_v10 = vlaneseq  ;;  %s1390_s24 = sld [smem:[#allocation2]]  ;;  %s1392_s25 = sld [smem:[#allocation2 + $0x1]] }
  0x10   :  { %v1005_v1 = vmul.f32 -1.442695, %v36_v0  ;;  %v1004_v4 = vmul.f32 -1.442695, %v35_v2  ;;  %v1007_v5 = vmul.f32 -1.442695, %v38_v3 }
  0x11   :  { %v37_v6 = vld [vmem:[%s2341_s1 + $0x10] sm:$0x1]  ;;  %v65_v8 = vmul.f32 1.442695, %v36_v0  ;;  %v63_v11 = vmul.f32 1.442695, %v35_v2 }
  0x12   :  { %1220 = vpow2.f32 %v1005_v1  ;;  %v1006_v7 = vmul.f32 -1.442695, %v37_v6  ;;  %v71_v16 = vshrl.u32 %v70_v10, 7  ;;  %v28_v21 = vld [vmem:[%s2342_s2] ss:$2 sm:$0x3] }
  0x13   :  { %1222 = vpow2.f32 %v1004_v4  ;;  %v1002_v22 = vld [vmem:[%s2342_s2 + $0x1] ss:$2 sm:$0x3]  ;;  %vm101_vm0 = vcmask 1040384   ;;  %vm104_vm1 = vcmask 1041408   ;;  %vm107_vm2 = vcmask 1042432  }
  0x14   :  { %1224 = vpow2.f32 %v1007_v5  ;;  %v76_v19 = vsub.s32 1, %v71_v16  ;;  %v72_v23 = vsub.s32 0, %v71_v16  ;;  %vm110_vm3 = vcmask 1043456   ;;  %v1011_v56 = vld [vmem:[%s2341_s1 + $0x28] sm:$0xff]  ;;  %v1010_v57 = vld [vmem:[%s2341_s1 + $0x20] sm:$0xff]  ;;  %s1008_s10 = sld [smem:[#allocation2 + $0x80]] }
  0x15   :  { %1226 = vpow2.f32 %v1006_v7  ;;  %v95_v27 = vstv %s1390_s24  ;;  %v98_v29 = vstv %s1392_s25  ;;  %v1015_v58 = vmul.f32 -1.442695, %v1011_v56  ;;  %v1013_v63 = vld [vmem:[%s2341_s1 + $0x38] sm:$0x1]  ;;  %v1012_v1 = vld [vmem:[%s2341_s1 + $0x30] sm:$0x1] }
  0x16   :  { %1228 = vpow2.f32 %v65_v8  ;;  %v1400_v25 = vrot.slane %v28_v21, %v76_v19  ;;  %v1402_v26 = vrot.slane %v1002_v22, %v76_v19  ;;  %v1406_v32 = vrot.slane %v28_v21, %v72_v23  ;;  %s1009_s11 = sld [smem:[#allocation2 + $0x81]]  ;;  %s1050_s0 = sld [smem:[#allocation2 + $0x100]] }
  0x17   :  { %v1408_v33 = vrot.slane %v1002_v22, %v72_v23  ;;  %v1014_v59 = vmul.f32 -1.442695, %v1010_v57  ;;  %v1017_v2 = vmul.f32 -1.442695, %v1013_v63  ;;  %v1016_v3 = vmul.f32 -1.442695, %v1012_v1 }
  0x18   :  { %v248_v4 = vmul.f32 1.442695, %v1011_v56  ;;  %v246_v5 = vmul.f32 1.442695, %v1010_v57  ;;  %s1051_s20 = sld [smem:[#allocation2 + $0x101]]  ;;  %vm179_vm4 = vcmask 72704  }
  0x19   :  { %s1552_s4 = sld [smem:[#allocation2 + $0x180]]  ;;  %s1562_s9 = sld [smem:[#allocation2 + $0x181]] }
  0x1a   :  { %s1722_s24 = sld [smem:[#allocation2 + $0x201]]  ;;  %s1872_s6 = sld [smem:[#allocation2 + $0x280]] }
  0x1c   :  { %v1221_v9 = vpop.eup %1220  ;;  %v259_v22 = vstv %s1009_s11  ;;  %v413_v1 = vstv %s1050_s0  ;;  %s1712_s0 = sld [smem:[#allocation2 + $0x200]]  ;;  %s1882_s11 = sld [smem:[#allocation2 + $0x281]] }
  0x1d   :  { %v52_v12 = vadd.f32 1.0, %v1221_v9  ;;  %v1223_v13 = vpop.eup %1222 }
  0x1e   :  { %v51_v14 = vadd.f32 1.0, %v1223_v13  ;;  %v1225_v15 = vpop.eup %1224 }
  0x1f   :  { %1230 = vrcp.f32 %v52_v12  ;;  %v1227_v17 = vpop.eup %1226  ;;  %v54_v18 = vadd.f32 1.0, %v1225_v15  ;;  %v256_v15 = vstv %s1008_s10 }
  0x20   :  { %1232 = vpow2.f32 %v63_v11  ;;  %v53_v20 = vadd.f32 1.0, %v1227_v17  ;;  %v1229_v24 = vpop.eup %1228 }
  0x21   :  { %1234 = vrcp.f32 %v51_v14  ;;  %v97_v35 = vmul.f32 %v1229_v24, %v95_v27  ;;  %v100_v38 = vmul.f32 %v1229_v24, %v98_v29 }
  0x22   :  { %1236 = vrcp.f32 %v54_v18 }
  0x23   :  { %1238 = vrcp.f32 %v53_v20 }
  0x24   :  { %1240 = vpow2.f32 %v1015_v58 }
  0x25   :  { %1242 = vpow2.f32 %v1014_v59 }
  0x29   :  { %v1231_v28 = vpop.eup %1230 }
  0x2a   :  { %v1233_v30 = vpop.eup %1232  ;;  %v68_v31 = vmul.f32 8.0, %v1231_v28 }
  0x2b   :  { %v1235_v34 = vpop.eup %1234  ;;  %v96_v40 = vmul.f32 %v1233_v30, %v95_v27  ;;  %v99_v44 = vmul.f32 %v1233_v30, %v98_v29 }
  0x2c   :  { %v81_v36 = vadd.f32 %v1400_v25, %v68_v31  ;;  %v94_v37 = vadd.f32 %v1402_v26, %v68_v31  ;;  %v67_v39 = vmul.f32 8.0, %v1235_v34  ;;  %v1237_v46 = vpop.eup %1236 }
  0x2d   :  { %v1239_v51 = vpop.eup %1238  ;;  %v114_v54 = vsel %vm101_vm0, %v1237_v46, 0.0 }
  0x2e   :  { %v103_v41 = vsel %vm101_vm0, %v81_v36, %v94_v37  ;;  %v80_v42 = vadd.f32 %v1406_v32, %v67_v39  ;;  %v93_v43 = vadd.f32 %v1408_v33, %v67_v39  ;;  %v113_v55 = vsel %vm101_vm0, %v1239_v51, 0.0  ;;  %v1241_v60 = vpop.eup %1240  ;;  %v1054_v51 = vld [vmem:[%s2341_s1 + $0x50] sm:$0x1] }
  0x2f   :  { %v106_v45 = vsel %vm104_vm1, %v103_v41, %v97_v35  ;;  %v1243_v61 = vpop.eup %1242  ;;  %v235_v62 = vadd.f32 1.0, %v1241_v60 }
  0x30   :  { %v109_v47 = vsel %vm107_vm2, %v106_v45, %v100_v38  ;;  %v102_v48 = vsel %vm101_vm0, %v80_v42, %v93_v43  ;;  %v234_v0 = vadd.f32 1.0, %v1243_v61  ;;  %v1053_v42 = vld [vmem:[%s2341_s1 + $0x48] sm:$0xff]  ;;  %v1052_v43 = vld [vmem:[%s2341_s1 + $0x40] sm:$0xff] }
  0x31   :  { %v112_v49 = vsel %vm110_vm3, %v109_v47, %v1231_v28  ;;  %v105_v50 = vsel %vm104_vm1, %v102_v48, %v96_v40  ;;  %1244 = vrcp.f32 %v235_v62  ;;  %v1056_v45 = vmul.f32 -1.442695, %v1052_v43 }
  0x32   :  { %147 = vxpose.xlu1.b32.start [1/2] (short) %v112_v49, 128  ;;  %v108_v52 = vsel %vm107_vm2, %v105_v50, %v99_v44  ;;  %1246 = vrcp.f32 %v234_v0  ;;  %v1057_v44 = vmul.f32 -1.442695, %v1053_v42  ;;  %v1055_v49 = vld [vmem:[%s2341_s1 + $0x58] sm:$0x1] }
  0x33   :  { %v111_v53 = vsel %vm110_vm3, %v108_v52, %v1235_v34  ;;  %1248 = vpow2.f32 %v1017_v2  ;;  %v1059_v52 = vmul.f32 -1.442695, %v1055_v49  ;;  %v1096_v49 = vld [vmem:[%s2341_s1 + $0x70] sm:$0x1] }
  0x34   :  { %115 = vxpose.xlu0.b32.start [1/2] (short) %v111_v53, 128  ;;  %1250 = vpow2.f32 %v1016_v3  ;;  %v1058_v53 = vmul.f32 -1.442695, %v1054_v51 }
  0x35   :  { %1252 = vpow2.f32 %v248_v4 }
  0x36   :  { %148 = vxpose.xlu1.b32.end [2/2] (short) %v114_v54, 128  ;;  %1254 = vpow2.f32 %v246_v5  ;;  %v405_v54 = vmul.f32 1.442695, %v1053_v42 }
  0x38   :  { %116 = vxpose.xlu0.b32.end [2/2] (short) %v113_v55, 128  ;;  %v403_v55 = vmul.f32 1.442695, %v1052_v43 }
  0x3b   :  { %v1245_v6 = vpop.eup %1244 }
  0x3c   :  { %v1247_v7 = vpop.eup %1246  ;;  %v251_v8 = vmul.f32 8.0, %v1245_v6 }
  0x3d   :  { %v1249_v9 = vpop.eup %1248  ;;  %v250_v10 = vmul.f32 8.0, %v1247_v7 }
  0x3e   :  { %v1251_v11 = vpop.eup %1250  ;;  %v253_v13 = vadd.f32 %v251_v8, %v1400_v25  ;;  %v255_v14 = vadd.f32 %v251_v8, %v1402_v26  ;;  %v237_v16 = vadd.f32 1.0, %v1249_v9  ;;  %v416_v8 = vstv %s1051_s20 }
  0x3f   :  { %v1253_v12 = vpop.eup %1252  ;;  %v252_v18 = vadd.f32 %v250_v10, %v1406_v32  ;;  %v254_v19 = vadd.f32 %v250_v10, %v1408_v33  ;;  %v236_v20 = vadd.f32 1.0, %v1251_v11 }
  0x40   :  { %v1255_v17 = vpop.eup %1254  ;;  %v258_v21 = vmul.f32 %v1253_v12, %v256_v15  ;;  %v263_v23 = vsel %vm101_vm0, %v253_v13, %v255_v14  ;;  %1256 = vrcp.f32 %v237_v16  ;;  %v261_v27 = vmul.f32 %v1253_v12, %v259_v22 }
  0x41   :  { %v257_v24 = vmul.f32 %v1255_v17, %v256_v15  ;;  %v262_v28 = vsel %vm101_vm0, %v252_v18, %v254_v19  ;;  %1258 = vrcp.f32 %v236_v20  ;;  %v260_v30 = vmul.f32 %v1255_v17, %v259_v22 }
  0x42   :  { %v265_v29 = vsel %vm104_vm1, %v263_v23, %v258_v21  ;;  %1260 = vpow2.f32 %v1057_v44 }
  0x43   :  { %v264_v31 = vsel %vm104_vm1, %v262_v28, %v257_v24  ;;  %v267_v34 = vsel %vm107_vm2, %v265_v29, %v261_v27  ;;  %1262 = vpow2.f32 %v1056_v45  ;;  %v1095_v24 = vld [vmem:[%s2341_s1 + $0x68] sm:$0xff]  ;;  %v1094_v28 = vld [vmem:[%s2341_s1 + $0x60] sm:$0xff] }
  0x44   :  { %v266_v35 = vsel %vm107_vm2, %v264_v31, %v260_v30  ;;  %v269_v36 = vsel %vm110_vm3, %v267_v34, %v1245_v6  ;;  %v1099_v30 = vmul.f32 -1.442695, %v1095_v24  ;;  %v1098_v34 = vmul.f32 -1.442695, %v1094_v28 }
  0x45   :  { %v268_v38 = vsel %vm110_vm3, %v266_v35, %v1247_v7 }
  0x4a   :  { %v1257_v37 = vpop.eup %1256 }
  0x4b   :  { %v1259_v39 = vpop.eup %1258  ;;  %v271_v40 = vsel %vm101_vm0, %v1257_v37, 0.0 }
  0x4c   :  { %v270_v41 = vsel %vm101_vm0, %v1259_v39, 0.0  ;;  %v1261_v46 = vpop.eup %1260 }
  0x4d   :  { %v1263_v47 = vpop.eup %1262  ;;  %v392_v48 = vadd.f32 1.0, %v1261_v46  ;;  %v1097_v46 = vld [vmem:[%s2341_s1 + $0x78] sm:$0x1] }
  0x4e   :  { %v391_v50 = vadd.f32 1.0, %v1263_v47 }
  0x4f   :  { %1264 = vrcp.f32 %v392_v48 }
  0x50   :  { %1266 = vrcp.f32 %v391_v50  ;;  %v1101_v50 = vmul.f32 -1.442695, %v1097_v46  ;;  %v1137_v46 = vld [vmem:[%s2341_s1 + $0x88] sm:$0xff] }
  0x51   :  { %1268 = vpow2.f32 %v1059_v52  ;;  %v1100_v52 = vmul.f32 -1.442695, %v1096_v49 }
  0x52   :  { %1270 = vpow2.f32 %v1058_v53 }
  0x53   :  { %1272 = vpow2.f32 %v405_v54  ;;  %v562_v54 = vmul.f32 1.442695, %v1095_v24 }
  0x54   :  { %1274 = vpow2.f32 %v403_v55 }
  0x59   :  { %v1265_v56 = vpop.eup %1264 }
  0x5a   :  { %v1267_v57 = vpop.eup %1266  ;;  %v408_v58 = vmul.f32 8.0, %v1265_v56 }
  0x5b   :  { %v1269_v59 = vpop.eup %1268  ;;  %v407_v60 = vmul.f32 8.0, %v1267_v57 }
  0x5c   :  { %v1271_v61 = vpop.eup %1270  ;;  %v410_v63 = vadd.f32 %v408_v58, %v1400_v25  ;;  %v412_v0 = vadd.f32 %v408_v58, %v1402_v26  ;;  %v394_v2 = vadd.f32 1.0, %v1269_v59 }
  0x5d   :  { %v1273_v62 = vpop.eup %1272  ;;  %v409_v4 = vadd.f32 %v407_v60, %v1406_v32  ;;  %v411_v5 = vadd.f32 %v407_v60, %v1408_v33  ;;  %v393_v6 = vadd.f32 1.0, %v1271_v61 }
  0x5e   :  { %v1275_v3 = vpop.eup %1274  ;;  %v415_v7 = vmul.f32 %v1273_v62, %v413_v1  ;;  %v420_v9 = vsel %vm101_vm0, %v410_v63, %v412_v0  ;;  %1276 = vrcp.f32 %v394_v2  ;;  %v418_v11 = vmul.f32 %v1273_v62, %v416_v8 }
  0x5f   :  { %v414_v10 = vmul.f32 %v1275_v3, %v413_v1  ;;  %v419_v12 = vsel %vm101_vm0, %v409_v4, %v411_v5  ;;  %1278 = vrcp.f32 %v393_v6  ;;  %v417_v14 = vmul.f32 %v1275_v3, %v416_v8 }
  0x60   :  { %v422_v13 = vsel %vm104_vm1, %v420_v9, %v415_v7  ;;  %1280 = vpow2.f32 %v1099_v30  ;;  %v570_v8 = vstv %s1552_s4 }
  0x61   :  { %v421_v15 = vsel %vm104_vm1, %v419_v12, %v414_v10  ;;  %v424_v16 = vsel %vm107_vm2, %v422_v13, %v418_v11  ;;  %1282 = vpow2.f32 %v1098_v34 }
  0x62   :  { %v423_v17 = vsel %vm107_vm2, %v421_v15, %v417_v14  ;;  %v426_v18 = vsel %vm110_vm3, %v424_v16, %v1265_v56  ;;  %v560_v56 = vmul.f32 1.442695, %v1094_v28  ;;  %v573_v16 = vstv %s1562_s9 }
  0x63   :  { %v425_v20 = vsel %vm110_vm3, %v423_v17, %v1267_v57 }
  0x68   :  { %v1277_v19 = vpop.eup %1276 }
  0x69   :  { %v1279_v21 = vpop.eup %1278  ;;  %v428_v22 = vsel %vm101_vm0, %v1277_v19, 0.0 }
  0x6a   :  { %v427_v23 = vsel %vm101_vm0, %v1279_v21, 0.0 }
  0x6f   :  { %304 = vxpose.xlu1.b32.start [1/2] (short) %v269_v36, 128 }
  0x71   :  { %272 = vxpose.xlu0.b32.start [1/2] (short) %v268_v38, 128 }
  0x73   :  { %305 = vxpose.xlu1.b32.end [2/2] (short) %v271_v40, 128  ;;  %v1281_v40 = vpop.eup %1280 }
  0x74   :  { %v1283_v42 = vpop.eup %1282  ;;  %v549_v44 = vadd.f32 1.0, %v1281_v40 }
  0x75   :  { %273 = vxpose.xlu0.b32.end [2/2] (short) %v270_v41, 128  ;;  %v548_v47 = vadd.f32 1.0, %v1283_v42 }
  0x76   :  { %1284 = vrcp.f32 %v549_v44 }
  0x77   :  { %1286 = vrcp.f32 %v548_v47 }
  0x78   :  { %1288 = vpow2.f32 %v1101_v50  ;;  %v1141_v50 = vmul.f32 -1.442695, %v1137_v46 }
  0x79   :  { %1290 = vpow2.f32 %v1100_v52 }
  0x7a   :  { %1292 = vpow2.f32 %v562_v54 }
  0x7b   :  { %1294 = vpow2.f32 %v560_v56 }
  0x80   :  { %v1285_v59 = vpop.eup %1284 }
  0x81   :  { %v1287_v61 = vpop.eup %1286  ;;  %v565_v63 = vmul.f32 8.0, %v1285_v59 }
  0x82   :  { %v1289_v0 = vpop.eup %1288  ;;  %v564_v2 = vmul.f32 8.0, %v1287_v61 }
  0x83   :  { %v1291_v3 = vpop.eup %1290  ;;  %v567_v6 = vadd.f32 %v565_v63, %v1400_v25  ;;  %v569_v7 = vadd.f32 %v565_v63, %v1402_v26  ;;  %v551_v9 = vadd.f32 1.0, %v1289_v0  ;;  %v1139_v0 = vld [vmem:[%s2341_s1 + $0x98] sm:$0x1] }
  0x84   :  { %v1293_v4 = vpop.eup %1292  ;;  %v566_v12 = vadd.f32 %v564_v2, %v1406_v32  ;;  %v568_v13 = vadd.f32 %v564_v2, %v1408_v33  ;;  %v550_v14 = vadd.f32 1.0, %v1291_v3  ;;  %v1138_v3 = vld [vmem:[%s2341_s1 + $0x90] sm:$0x1] }
  0x85   :  { %v1295_v10 = vpop.eup %1294  ;;  %v572_v15 = vmul.f32 %v1293_v4, %v570_v8  ;;  %1296 = vrcp.f32 %v551_v9  ;;  %v575_v21 = vmul.f32 %v1293_v4, %v573_v16  ;;  %v1143_v4 = vmul.f32 -1.442695, %v1139_v0  ;;  %v1179_v0 = vld [vmem:[%s2341_s1 + $0xa8] sm:$0xff] }
  0x86   :  { %v571_v19 = vmul.f32 %v1295_v10, %v570_v8  ;;  %1298 = vrcp.f32 %v550_v14  ;;  %v719_v8 = vmul.f32 1.442695, %v1137_v46 }
  0x87   :  { %1300 = vpow2.f32 %v1141_v50 }
  0xac   :  { %461 = vxpose.xlu1.b32.start [1/2] (short) %v426_v18, 128  ;;  %v577_v18 = vsel %vm101_vm0, %v567_v6, %v569_v7  ;;  %v1142_v6 = vmul.f32 -1.442695, %v1138_v3 }
  0xae   :  { %429 = vxpose.xlu0.b32.start [1/2] (short) %v425_v20, 128 }
  0xb0   :  { %462 = vxpose.xlu1.b32.end [2/2] (short) %v428_v22, 128  ;;  %v576_v22 = vsel %vm101_vm0, %v566_v12, %v568_v13 }
  0xb1   :  { %v578_v28 = vsel %vm104_vm1, %v576_v22, %v571_v19 }
  0xb2   :  { %v163_v27 = vpop.trf.xlu1  ;;  %430 = vxpose.xlu0.b32.end [2/2] (short) %v427_v23, 128  ;;  %v579_v23 = vsel %vm104_vm1, %v577_v18, %v572_v15 }
  0xb3   :  { %196 = vst.msk [vmem:[%s2343_s3 + $0x80] sm:$0xff] %vm179_vm4, %v163_v27  ;;  %v574_v27 = vmul.f32 %v1295_v10, %v573_v16  ;;  %v581_v30 = vsel %vm107_vm2, %v579_v23, %v575_v21 }
  0xb4   :  { %v131_v29 = vpop.trf.xlu0 }
  0xb5   :  { %180 = vst.msk [vmem:[%s2343_s3] sm:$0xff] %vm179_vm4, %v131_v29  ;;  %v580_v34 = vsel %vm107_vm2, %v578_v28, %v574_v27  ;;  %v727_v28 = vstv %s1712_s0 }
  0xb6   :  { %v164_v31 = vpop.trf.xlu1 }
  0xb7   :  { %197 = vst.msk [vmem:[%s2343_s3 + $0x88] sm:$0xff] %vm179_vm4, %v164_v31 }
  0xb8   :  { %v132_v35 = vpop.trf.xlu0 }
  0xb9   :  { %181 = vst.msk [vmem:[%s2343_s3 + $0x8] sm:$0xff] %vm179_vm4, %v132_v35  ;;  %v583_v35 = vsel %vm110_vm3, %v581_v30, %v1285_v59 }
  0xba   :  { %v165_v36 = vpop.trf.xlu1 }
  0xbb   :  { %198 = vst.msk [vmem:[%s2343_s3 + $0x90] sm:$0xff] %vm179_vm4, %v165_v36  ;;  %v1297_v36 = vpop.eup %1296 }
  0xbc   :  { %v133_v37 = vpop.trf.xlu0 }
  0xbd   :  { %182 = vst.msk [vmem:[%s2343_s3 + $0x10] sm:$0xff] %vm179_vm4, %v133_v37 }
  0xbe   :  { %v166_v38 = vpop.trf.xlu1 }
  0xbf   :  { %199 = vst.msk [vmem:[%s2343_s3 + $0x98] sm:$0xff] %vm179_vm4, %v166_v38  ;;  %v582_v38 = vsel %vm110_vm3, %v580_v34, %v1287_v61 }
  0xc0   :  { %v134_v39 = vpop.trf.xlu0 }
  0xc1   :  { %183 = vst.msk [vmem:[%s2343_s3 + $0x18] sm:$0xff] %vm179_vm4, %v134_v39  ;;  %v1299_v39 = vpop.eup %1298 }
  0xc2   :  { %v167_v41 = vpop.trf.xlu1 }
  0xc3   :  { %200 = vst.msk [vmem:[%s2343_s3 + $0xa0] sm:$0xff] %vm179_vm4, %v167_v41  ;;  %v585_v41 = vsel %vm101_vm0, %v1297_v36, 0.0 }
  0xc4   :  { %v135_v43 = vpop.trf.xlu0 }
  0xc5   :  { %184 = vst.msk [vmem:[%s2343_s3 + $0x20] sm:$0xff] %vm179_vm4, %v135_v43  ;;  %v584_v43 = vsel %vm101_vm0, %v1299_v39, 0.0 }
  0xc6   :  { %v168_v45 = vpop.trf.xlu1 }
  0xc7   :  { %201 = vst.msk [vmem:[%s2343_s3 + $0xa8] sm:$0xff] %vm179_vm4, %v168_v45 }
  0xc8   :  { %v136_v48 = vpop.trf.xlu0 }
  0xc9   :  { %185 = vst.msk [vmem:[%s2343_s3 + $0x28] sm:$0xff] %vm179_vm4, %v136_v48  ;;  %v1136_v48 = vld [vmem:[%s2341_s1 + $0x80] sm:$0xff] }
  0xca   :  { %v169_v51 = vpop.trf.xlu1  ;;  %v1140_v52 = vmul.f32 -1.442695, %v1136_v48  ;;  %v717_v10 = vmul.f32 1.442695, %v1136_v48 }
  0xcb   :  { %202 = vst.msk [vmem:[%s2343_s3 + $0xb0] sm:$0xff] %vm179_vm4, %v169_v51 }
  0xcc   :  { %v137_v53 = vpop.trf.xlu0  ;;  %1302 = vpow2.f32 %v1140_v52 }
  0xcd   :  { %186 = vst.msk [vmem:[%s2343_s3 + $0x30] sm:$0xff] %vm179_vm4, %v137_v53 }
  0xce   :  { %v170_v55 = vpop.trf.xlu1 }
  0xcf   :  { %203 = vst.msk [vmem:[%s2343_s3 + $0xb8] sm:$0xff] %vm179_vm4, %v170_v55 }
  0xd0   :  { %v138_v57 = vpop.trf.xlu0 }
  0xd1   :  { %187 = vst.msk [vmem:[%s2343_s3 + $0x38] sm:$0xff] %vm179_vm4, %v138_v57 }
  0xd2   :  { %v171_v58 = vpop.trf.xlu1 }
  0xd3   :  { %204 = vst.msk [vmem:[%s2343_s3 + $0xc0] sm:$0xff] %vm179_vm4, %v171_v58  ;;  %v1301_v58 = vpop.eup %1300 }
  0xd4   :  { %v139_v60 = vpop.trf.xlu0 }
  0xd5   :  { %188 = vst.msk [vmem:[%s2343_s3 + $0x40] sm:$0xff] %vm179_vm4, %v139_v60 }
  0xd6   :  { %v172_v62 = vpop.trf.xlu1  ;;  %v1303_v60 = vpop.eup %1302 }
  0xd7   :  { %205 = vst.msk [vmem:[%s2343_s3 + $0xc8] sm:$0xff] %vm179_vm4, %v172_v62  ;;  %v706_v62 = vadd.f32 1.0, %v1301_v58 }
  0xd8   :  { %v140_v1 = vpop.trf.xlu0 }
  0xd9   :  { %189 = vst.msk [vmem:[%s2343_s3 + $0x48] sm:$0xff] %vm179_vm4, %v140_v1  ;;  %v705_v1 = vadd.f32 1.0, %v1303_v60  ;;  %1304 = vrcp.f32 %v706_v62 }
  0xda   :  { %v173_v5 = vpop.trf.xlu1 }
  0xdb   :  { %206 = vst.msk [vmem:[%s2343_s3 + $0xd0] sm:$0xff] %vm179_vm4, %v173_v5  ;;  %1306 = vrcp.f32 %v705_v1 }
  0xdc   :  { %v141_v11 = vpop.trf.xlu0  ;;  %1308 = vpow2.f32 %v1143_v4  ;;  %v1183_v4 = vmul.f32 -1.442695, %v1179_v0 }
  0xdd   :  { %190 = vst.msk [vmem:[%s2343_s3 + $0x50] sm:$0xff] %vm179_vm4, %v141_v11  ;;  %1310 = vpow2.f32 %v1142_v6 }
  0xde   :  { %v174_v17 = vpop.trf.xlu1  ;;  %1312 = vpow2.f32 %v719_v8 }
  0xdf   :  { %207 = vst.msk [vmem:[%s2343_s3 + $0xd8] sm:$0xff] %vm179_vm4, %v174_v17  ;;  %1314 = vpow2.f32 %v717_v10 }
  0xe0   :  { %v142_v20 = vpop.trf.xlu0 }
  0xe1   :  { %191 = vst.msk [vmem:[%s2343_s3 + $0x58] sm:$0xff] %vm179_vm4, %v142_v20 }
  0xe2   :  { %v175_v24 = vpop.trf.xlu1 }
  0xe3   :  { %208 = vst.msk [vmem:[%s2343_s3 + $0xe0] sm:$0xff] %vm179_vm4, %v175_v24  ;;  %v1305_v13 = vpop.eup %1304 }
  0xe4   :  { %v143_v29 = vpop.trf.xlu0  ;;  %v722_v17 = vmul.f32 8.0, %v1305_v13 }
  0xe5   :  { %192 = vst.msk [vmem:[%s2343_s3 + $0x60] sm:$0xff] %vm179_vm4, %v143_v29  ;;  %v1307_v15 = vpop.eup %1306 }
  0xe6   :  { %v176_v31 = vpop.trf.xlu1  ;;  %v1309_v18 = vpop.eup %1308  ;;  %v721_v20 = vmul.f32 8.0, %v1307_v15  ;;  %v724_v24 = vadd.f32 %v722_v17, %v1400_v25  ;;  %v726_v27 = vadd.f32 %v722_v17, %v1402_v26 }
  0xe7   :  { %209 = vst.msk [vmem:[%s2343_s3 + $0xe8] sm:$0xff] %vm179_vm4, %v176_v31  ;;  %v1311_v21 = vpop.eup %1310  ;;  %v708_v29 = vadd.f32 1.0, %v1309_v18  ;;  %v1181_v18 = vld [vmem:[%s2341_s1 + $0xb8] sm:$0x1] }
  0xe8   :  { %v144_v37 = vpop.trf.xlu0  ;;  %v1313_v22 = vpop.eup %1312  ;;  %v723_v34 = vadd.f32 %v721_v20, %v1406_v32  ;;  %v707_v36 = vadd.f32 1.0, %v1311_v21  ;;  %v1180_v21 = vld [vmem:[%s2341_s1 + $0xb0] sm:$0x1] }
  0xe9   :  { %193 = vst.msk [vmem:[%s2343_s3 + $0x68] sm:$0xff] %vm179_vm4, %v144_v37  ;;  %v1315_v30 = vpop.eup %1314  ;;  %v729_v37 = vmul.f32 %v1313_v22, %v727_v28  ;;  %1316 = vrcp.f32 %v708_v29 }
  0xea   :  { %v177_v40 = vpop.trf.xlu1  ;;  %618 = vxpose.xlu1.b32.start [1/2] (short) %v583_v35, 128  ;;  %v725_v35 = vadd.f32 %v721_v20, %v1408_v33  ;;  %1318 = vrcp.f32 %v707_v36 }
  0xeb   :  { %210 = vst.msk [vmem:[%s2343_s3 + $0xf0] sm:$0xff] %vm179_vm4, %v177_v40  ;;  %v734_v40 = vsel %vm101_vm0, %v724_v24, %v726_v27  ;;  %1320 = vpow2.f32 %v1183_v4  ;;  %v1184_v24 = vmul.f32 -1.442695, %v1180_v21 }
  0xec   :  { %v145_v42 = vpop.trf.xlu0  ;;  %586 = vxpose.xlu0.b32.start [1/2] (short) %v582_v38, 128  ;;  %v730_v38 = vstv %s1722_s24 }
  0xed   :  { %194 = vst.msk [vmem:[%s2343_s3 + $0x70] sm:$0xff] %vm179_vm4, %v145_v42 }
  0xee   :  { %v178_v44 = vpop.trf.xlu1  ;;  %619 = vxpose.xlu1.b32.end [2/2] (short) %v585_v41, 128  ;;  %v728_v41 = vmul.f32 %v1315_v30, %v727_v28  ;;  %v876_v28 = vmul.f32 1.442695, %v1179_v0 }
  0xef   :  { %211 = vst.msk [vmem:[%s2343_s3 + $0xf8] sm:$0xff] %vm179_vm4, %v178_v44  ;;  %v733_v44 = vsel %vm101_vm0, %v723_v34, %v725_v35 }
  0xf0   :  { %v146_v45 = vpop.trf.xlu0  ;;  %587 = vxpose.xlu0.b32.end [2/2] (short) %v584_v43, 128  ;;  %v732_v43 = vmul.f32 %v1313_v22, %v730_v38  ;;  %v735_v48 = vsel %vm104_vm1, %v733_v44, %v728_v41  ;;  %v1185_v22 = vmul.f32 -1.442695, %v1181_v18 }
  0xf1   :  { %195 = vst.msk [vmem:[%s2343_s3 + $0x78] sm:$0xff] %vm179_vm4, %v146_v45  ;;  %v736_v45 = vsel %vm104_vm1, %v734_v40, %v729_v37 }
  0xf2   :  { %v320_v47 = vpop.trf.xlu1  ;;  %v738_v50 = vsel %vm107_vm2, %v736_v45, %v732_v43 }
  0xf3   :  { %1034 = vst.msk [vmem:[%s2343_s3 + $0x180] sm:$0xff] %vm179_vm4, %v320_v47  ;;  %v731_v47 = vmul.f32 %v1315_v30, %v730_v38 }
  0xf4   :  { %v288_v49 = vpop.trf.xlu0 }
  0xf5   :  { %1018 = vst.msk [vmem:[%s2343_s3 + $0x100] sm:$0xff] %vm179_vm4, %v288_v49  ;;  %v737_v52 = vsel %vm107_vm2, %v735_v48, %v731_v47  ;;  %v884_v48 = vstv %s1872_s6 }
  0xf6   :  { %v321_v51 = vpop.trf.xlu1 }
  0xf7   :  { %1035 = vst.msk [vmem:[%s2343_s3 + $0x188] sm:$0xff] %vm179_vm4, %v321_v51 }
  0xf8   :  { %v289_v53 = vpop.trf.xlu0 }
  0xf9   :  { %1019 = vst.msk [vmem:[%s2343_s3 + $0x108] sm:$0xff] %vm179_vm4, %v289_v53  ;;  %v740_v53 = vsel %vm110_vm3, %v738_v50, %v1305_v13 }
  0xfa   :  { %v322_v54 = vpop.trf.xlu1 }
  0xfb   :  { %1036 = vst.msk [vmem:[%s2343_s3 + $0x190] sm:$0xff] %vm179_vm4, %v322_v54  ;;  %v1317_v54 = vpop.eup %1316 }
  0xfc   :  { %v290_v55 = vpop.trf.xlu0 }
  0xfd   :  { %1020 = vst.msk [vmem:[%s2343_s3 + $0x110] sm:$0xff] %vm179_vm4, %v290_v55 }
  0xfe   :  { %v323_v56 = vpop.trf.xlu1 }
  0xff   :  { %1037 = vst.msk [vmem:[%s2343_s3 + $0x198] sm:$0xff] %vm179_vm4, %v323_v56  ;;  %v739_v56 = vsel %vm110_vm3, %v737_v52, %v1307_v15 }
 0x100   :  { %v291_v57 = vpop.trf.xlu0 }
 0x101   :  { %1021 = vst.msk [vmem:[%s2343_s3 + $0x118] sm:$0xff] %vm179_vm4, %v291_v57  ;;  %v1319_v57 = vpop.eup %1318 }
 0x102   :  { %v324_v59 = vpop.trf.xlu1 }
 0x103   :  { %1038 = vst.msk [vmem:[%s2343_s3 + $0x1a0] sm:$0xff] %vm179_vm4, %v324_v59  ;;  %v742_v59 = vsel %vm101_vm0, %v1317_v54, 0.0 }
 0x104   :  { %v292_v61 = vpop.trf.xlu0 }
 0x105   :  { %1022 = vst.msk [vmem:[%s2343_s3 + $0x120] sm:$0xff] %vm179_vm4, %v292_v61  ;;  %v741_v61 = vsel %vm101_vm0, %v1319_v57, 0.0 }
 0x106   :  { %v325_v63 = vpop.trf.xlu1 }
 0x107   :  { %1039 = vst.msk [vmem:[%s2343_s3 + $0x1a8] sm:$0xff] %vm179_vm4, %v325_v63 }
 0x108   :  { %v293_v2 = vpop.trf.xlu0 }
 0x109   :  { %1023 = vst.msk [vmem:[%s2343_s3 + $0x128] sm:$0xff] %vm179_vm4, %v293_v2  ;;  %v1178_v2 = vld [vmem:[%s2341_s1 + $0xa0] sm:$0xff] }
 0x10a   :  { %v326_v5 = vpop.trf.xlu1  ;;  %v1182_v6 = vmul.f32 -1.442695, %v1178_v2  ;;  %v874_v30 = vmul.f32 1.442695, %v1178_v2 }
 0x10b   :  { %1040 = vst.msk [vmem:[%s2343_s3 + $0x1b0] sm:$0xff] %vm179_vm4, %v326_v5 }
 0x10c   :  { %v294_v7 = vpop.trf.xlu0  ;;  %1322 = vpow2.f32 %v1182_v6 }
 0x10d   :  { %1024 = vst.msk [vmem:[%s2343_s3 + $0x130] sm:$0xff] %vm179_vm4, %v294_v7 }
 0x10e   :  { %v327_v9 = vpop.trf.xlu1 }
 0x10f   :  { %1041 = vst.msk [vmem:[%s2343_s3 + $0x1b8] sm:$0xff] %vm179_vm4, %v327_v9 }
 0x110   :  { %v295_v11 = vpop.trf.xlu0 }
 0x111   :  { %1025 = vst.msk [vmem:[%s2343_s3 + $0x138] sm:$0xff] %vm179_vm4, %v295_v11 }
 0x112   :  { %v328_v12 = vpop.trf.xlu1 }
 0x113   :  { %1042 = vst.msk [vmem:[%s2343_s3 + $0x1c0] sm:$0xff] %vm179_vm4, %v328_v12  ;;  %v1321_v12 = vpop.eup %1320 }
 0x114   :  { %v296_v14 = vpop.trf.xlu0 }
 0x115   :  { %1026 = vst.msk [vmem:[%s2343_s3 + $0x140] sm:$0xff] %vm179_vm4, %v296_v14 }
 0x116   :  { %v329_v16 = vpop.trf.xlu1  ;;  %v1323_v14 = vpop.eup %1322 }
 0x117   :  { %1043 = vst.msk [vmem:[%s2343_s3 + $0x1c8] sm:$0xff] %vm179_vm4, %v329_v16  ;;  %v863_v16 = vadd.f32 1.0, %v1321_v12 }
 0x118   :  { %v297_v19 = vpop.trf.xlu0 }
 0x119   :  { %1027 = vst.msk [vmem:[%s2343_s3 + $0x148] sm:$0xff] %vm179_vm4, %v297_v19  ;;  %v862_v19 = vadd.f32 1.0, %v1323_v14  ;;  %1324 = vrcp.f32 %v863_v16 }
 0x11a   :  { %v330_v23 = vpop.trf.xlu1 }
 0x11b   :  { %1044 = vst.msk [vmem:[%s2343_s3 + $0x1d0] sm:$0xff] %vm179_vm4, %v330_v23  ;;  %1326 = vrcp.f32 %v862_v19 }
 0x11c   :  { %v298_v31 = vpop.trf.xlu0  ;;  %1328 = vpow2.f32 %v1185_v22 }
 0x11d   :  { %1028 = vst.msk [vmem:[%s2343_s3 + $0x150] sm:$0xff] %vm179_vm4, %v298_v31  ;;  %1330 = vpow2.f32 %v1184_v24 }
 0x11e   :  { %v331_v39 = vpop.trf.xlu1  ;;  %1332 = vpow2.f32 %v876_v28 }
 0x11f   :  { %1045 = vst.msk [vmem:[%s2343_s3 + $0x1d8] sm:$0xff] %vm179_vm4, %v331_v39  ;;  %1334 = vpow2.f32 %v874_v30 }
 0x120   :  { %v299_v42 = vpop.trf.xlu0 }
 0x121   :  { %1029 = vst.msk [vmem:[%s2343_s3 + $0x158] sm:$0xff] %vm179_vm4, %v299_v42 }
 0x122   :  { %v332_v46 = vpop.trf.xlu1 }
 0x123   :  { %1046 = vst.msk [vmem:[%s2343_s3 + $0x1e0] sm:$0xff] %vm179_vm4, %v332_v46  ;;  %v1325_v35 = vpop.eup %1324 }
 0x124   :  { %v300_v49 = vpop.trf.xlu0  ;;  %v879_v39 = vmul.f32 8.0, %v1325_v35 }
 0x125   :  { %1030 = vst.msk [vmem:[%s2343_s3 + $0x160] sm:$0xff] %vm179_vm4, %v300_v49  ;;  %v1327_v37 = vpop.eup %1326 }
 0x126   :  { %v333_v51 = vpop.trf.xlu1  ;;  %v1329_v40 = vpop.eup %1328  ;;  %v878_v42 = vmul.f32 8.0, %v1327_v37  ;;  %v881_v46 = vadd.f32 %v879_v39, %v1400_v25  ;;  %v883_v47 = vadd.f32 %v879_v39, %v1402_v26  ;;  %v887_v26 = vstv %s1882_s11 }
 0x127   :  { %1047 = vst.msk [vmem:[%s2343_s3 + $0x1e8] sm:$0xff] %vm179_vm4, %v333_v51  ;;  %v1331_v43 = vpop.eup %1330  ;;  %v865_v49 = vadd.f32 1.0, %v1329_v40 }
 0x128   :  { %v301_v55 = vpop.trf.xlu0  ;;  %v1333_v44 = vpop.eup %1332  ;;  %v880_v52 = vadd.f32 %v878_v42, %v1406_v32  ;;  %v864_v54 = vadd.f32 1.0, %v1331_v43 }
 0x129   :  { %1031 = vst.msk [vmem:[%s2343_s3 + $0x168] sm:$0xff] %vm179_vm4, %v301_v55  ;;  %v1335_v50 = vpop.eup %1334  ;;  %v886_v25 = vmul.f32 %v1333_v44, %v884_v48  ;;  %1336 = vrcp.f32 %v865_v49 }
 0x12a   :  { %v334_v58 = vpop.trf.xlu1  ;;  %775 = vxpose.xlu1.b32.start [1/2] (short) %v740_v53, 128  ;;  %v882_v53 = vadd.f32 %v878_v42, %v1408_v33  ;;  %v885_v32 = vmul.f32 %v1335_v50, %v884_v48  ;;  %v889_v33 = vmul.f32 %v1333_v44, %v887_v26  ;;  %1338 = vrcp.f32 %v864_v54 }
 0x12b   :  { %1048 = vst.msk [vmem:[%s2343_s3 + $0x1f0] sm:$0xff] %vm179_vm4, %v334_v58 }
 0x12c   :  { %v302_v60 = vpop.trf.xlu0  ;;  %743 = vxpose.xlu0.b32.start [1/2] (short) %v739_v56, 128  ;;  %v891_v56 = vsel %vm101_vm0, %v881_v46, %v883_v47  ;;  %v890_v58 = vsel %vm101_vm0, %v880_v52, %v882_v53 }
 0x12d   :  { %1032 = vst.msk [vmem:[%s2343_s3 + $0x170] sm:$0xff] %vm179_vm4, %v302_v60 }
 0x12e   :  { %v335_v62 = vpop.trf.xlu1  ;;  %776 = vxpose.xlu1.b32.end [2/2] (short) %v742_v59, 128  ;;  %v893_v59 = vsel %vm104_vm1, %v891_v56, %v886_v25 }
 0x12f   :  { %1049 = vst.msk [vmem:[%s2343_s3 + $0x1f8] sm:$0xff] %vm179_vm4, %v335_v62  ;;  %v892_v62 = vsel %vm104_vm1, %v890_v58, %v885_v32  ;;  %v895_v0 = vsel %vm107_vm2, %v893_v59, %v889_v33 }
 0x130   :  { %v303_v63 = vpop.trf.xlu0  ;;  %744 = vxpose.xlu0.b32.end [2/2] (short) %v741_v61, 128  ;;  %v888_v61 = vmul.f32 %v1335_v50, %v887_v26 }
 0x131   :  { %1033 = vst.msk [vmem:[%s2343_s3 + $0x178] sm:$0xff] %vm179_vm4, %v303_v63 }
 0x132   :  { %v477_v1 = vpop.trf.xlu1  ;;  %v894_v2 = vsel %vm107_vm2, %v892_v62, %v888_v61 }
 0x133   :  { %1076 = vst.msk [vmem:[%s2343_s3 + $0x280] sm:$0xff] %vm179_vm4, %v477_v1  ;;  %v1337_v4 = vpop.eup %1336  ;;  %v896_v6 = vsel %vm110_vm3, %v894_v2, %v1327_v37 }
 0x134   :  { %v445_v3 = vpop.trf.xlu0 }
 0x135   :  { %1060 = vst.msk [vmem:[%s2343_s3 + $0x200] sm:$0xff] %vm179_vm4, %v445_v3  ;;  %v897_v3 = vsel %vm110_vm3, %v895_v0, %v1325_v35 }
 0x136   :  { %v478_v5 = vpop.trf.xlu1 }
 0x137   :  { %1077 = vst.msk [vmem:[%s2343_s3 + $0x288] sm:$0xff] %vm179_vm4, %v478_v5 }
 0x138   :  { %v446_v7 = vpop.trf.xlu0 }
 0x139   :  { %1061 = vst.msk [vmem:[%s2343_s3 + $0x208] sm:$0xff] %vm179_vm4, %v446_v7  ;;  %v1339_v7 = vpop.eup %1338 }
 0x13a   :  { %v479_v8 = vpop.trf.xlu1 }
 0x13b   :  { %1078 = vst.msk [vmem:[%s2343_s3 + $0x290] sm:$0xff] %vm179_vm4, %v479_v8 }
 0x13c   :  { %v447_v9 = vpop.trf.xlu0 }
 0x13d   :  { %1062 = vst.msk [vmem:[%s2343_s3 + $0x210] sm:$0xff] %vm179_vm4, %v447_v9  ;;  %v899_v9 = vsel %vm101_vm0, %v1337_v4, 0.0 }
 0x13e   :  { %v480_v10 = vpop.trf.xlu1 }
 0x13f   :  { %1079 = vst.msk [vmem:[%s2343_s3 + $0x298] sm:$0xff] %vm179_vm4, %v480_v10 }
 0x140   :  { %v448_v11 = vpop.trf.xlu0 }
 0x141   :  { %1063 = vst.msk [vmem:[%s2343_s3 + $0x218] sm:$0xff] %vm179_vm4, %v448_v11  ;;  %v898_v11 = vsel %vm101_vm0, %v1339_v7, 0.0 }
 0x142   :  { %v481_v13 = vpop.trf.xlu1 }
 0x143   :  { %1080 = vst.msk [vmem:[%s2343_s3 + $0x2a0] sm:$0xff] %vm179_vm4, %v481_v13 }
 0x144   :  { %v449_v15 = vpop.trf.xlu0 }
 0x145   :  { %1064 = vst.msk [vmem:[%s2343_s3 + $0x220] sm:$0xff] %vm179_vm4, %v449_v15 }
 0x146   :  { %v482_v17 = vpop.trf.xlu1 }
 0x147   :  { %1081 = vst.msk [vmem:[%s2343_s3 + $0x2a8] sm:$0xff] %vm179_vm4, %v482_v17 }
 0x148   :  { %v450_v20 = vpop.trf.xlu0 }
 0x149   :  { %1065 = vst.msk [vmem:[%s2343_s3 + $0x228] sm:$0xff] %vm179_vm4, %v450_v20 }
 0x14a   :  { %v483_v23 = vpop.trf.xlu1 }
 0x14b   :  { %1082 = vst.msk [vmem:[%s2343_s3 + $0x2b0] sm:$0xff] %vm179_vm4, %v483_v23 }
 0x14c   :  { %v451_v27 = vpop.trf.xlu0 }
 0x14d   :  { %1066 = vst.msk [vmem:[%s2343_s3 + $0x230] sm:$0xff] %vm179_vm4, %v451_v27 }
 0x14e   :  { %v484_v29 = vpop.trf.xlu1 }
 0x14f   :  { %1083 = vst.msk [vmem:[%s2343_s3 + $0x2b8] sm:$0xff] %vm179_vm4, %v484_v29 }
 0x150   :  { %v452_v31 = vpop.trf.xlu0 }
 0x151   :  { %1067 = vst.msk [vmem:[%s2343_s3 + $0x238] sm:$0xff] %vm179_vm4, %v452_v31 }
 0x152   :  { %v485_v34 = vpop.trf.xlu1 }
 0x153   :  { %1084 = vst.msk [vmem:[%s2343_s3 + $0x2c0] sm:$0xff] %vm179_vm4, %v485_v34 }
 0x154   :  { %v453_v36 = vpop.trf.xlu0 }
 0x155   :  { %1068 = vst.msk [vmem:[%s2343_s3 + $0x240] sm:$0xff] %vm179_vm4, %v453_v36 }
 0x156   :  { %v486_v38 = vpop.trf.xlu1 }
 0x157   :  { %1085 = vst.msk [vmem:[%s2343_s3 + $0x2c8] sm:$0xff] %vm179_vm4, %v486_v38 }
 0x158   :  { %v454_v41 = vpop.trf.xlu0 }
 0x159   :  { %1069 = vst.msk [vmem:[%s2343_s3 + $0x248] sm:$0xff] %vm179_vm4, %v454_v41 }
 0x15a   :  { %v487_v45 = vpop.trf.xlu1 }
 0x15b   :  { %1086 = vst.msk [vmem:[%s2343_s3 + $0x2d0] sm:$0xff] %vm179_vm4, %v487_v45 }
 0x15c   :  { %v455_v51 = vpop.trf.xlu0 }
 0x15d   :  { %1070 = vst.msk [vmem:[%s2343_s3 + $0x250] sm:$0xff] %vm179_vm4, %v455_v51 }
 0x15e   :  { %v488_v55 = vpop.trf.xlu1 }
 0x15f   :  { %1087 = vst.msk [vmem:[%s2343_s3 + $0x2d8] sm:$0xff] %vm179_vm4, %v488_v55 }
 0x160   :  { %v456_v57 = vpop.trf.xlu0 }
 0x161   :  { %1071 = vst.msk [vmem:[%s2343_s3 + $0x258] sm:$0xff] %vm179_vm4, %v456_v57 }
 0x162   :  { %v489_v60 = vpop.trf.xlu1 }
 0x163   :  { %1088 = vst.msk [vmem:[%s2343_s3 + $0x2e0] sm:$0xff] %vm179_vm4, %v489_v60 }
 0x164   :  { %v457_v63 = vpop.trf.xlu0 }
 0x165   :  { %1072 = vst.msk [vmem:[%s2343_s3 + $0x260] sm:$0xff] %vm179_vm4, %v457_v63 }
 0x166   :  { %v490_v1 = vpop.trf.xlu1 }
 0x167   :  { %1089 = vst.msk [vmem:[%s2343_s3 + $0x2e8] sm:$0xff] %vm179_vm4, %v490_v1 }
 0x168   :  { %v458_v5 = vpop.trf.xlu0 }
 0x169   :  { %1073 = vst.msk [vmem:[%s2343_s3 + $0x268] sm:$0xff] %vm179_vm4, %v458_v5 }
 0x16a   :  { %v491_v8 = vpop.trf.xlu1  ;;  %932 = vxpose.xlu1.b32.start [1/2] (short) %v897_v3, 128 }
 0x16b   :  { %1090 = vst.msk [vmem:[%s2343_s3 + $0x2f0] sm:$0xff] %vm179_vm4, %v491_v8 }
 0x16c   :  { %v459_v10 = vpop.trf.xlu0  ;;  %900 = vxpose.xlu0.b32.start [1/2] (short) %v896_v6, 128 }
 0x16d   :  { %1074 = vst.msk [vmem:[%s2343_s3 + $0x270] sm:$0xff] %vm179_vm4, %v459_v10 }
 0x16e   :  { %v492_v12 = vpop.trf.xlu1  ;;  %933 = vxpose.xlu1.b32.end [2/2] (short) %v899_v9, 128 }
 0x16f   :  { %1091 = vst.msk [vmem:[%s2343_s3 + $0x2f8] sm:$0xff] %vm179_vm4, %v492_v12 }
 0x170   :  { %v460_v13 = vpop.trf.xlu0  ;;  %901 = vxpose.xlu0.b32.end [2/2] (short) %v898_v11, 128 }
 0x171   :  { %1075 = vst.msk [vmem:[%s2343_s3 + $0x278] sm:$0xff] %vm179_vm4, %v460_v13 }
 0x172   :  { %v634_v14 = vpop.trf.xlu1 }
 0x173   :  { %1118 = vst.msk [vmem:[%s2343_s3 + $0x380] sm:$0xff] %vm179_vm4, %v634_v14 }
 0x174   :  { %v602_v15 = vpop.trf.xlu0 }
 0x175   :  { %1102 = vst.msk [vmem:[%s2343_s3 + $0x300] sm:$0xff] %vm179_vm4, %v602_v15 }
 0x176   :  { %v635_v16 = vpop.trf.xlu1 }
 0x177   :  { %1119 = vst.msk [vmem:[%s2343_s3 + $0x388] sm:$0xff] %vm179_vm4, %v635_v16 }
 0x178   :  { %v603_v17 = vpop.trf.xlu0 }
 0x179   :  { %1103 = vst.msk [vmem:[%s2343_s3 + $0x308] sm:$0xff] %vm179_vm4, %v603_v17 }
 0x17a   :  { %v636_v18 = vpop.trf.xlu1 }
 0x17b   :  { %1120 = vst.msk [vmem:[%s2343_s3 + $0x390] sm:$0xff] %vm179_vm4, %v636_v18 }
 0x17c   :  { %v604_v19 = vpop.trf.xlu0 }
 0x17d   :  { %1104 = vst.msk [vmem:[%s2343_s3 + $0x310] sm:$0xff] %vm179_vm4, %v604_v19 }
 0x17e   :  { %v637_v20 = vpop.trf.xlu1 }
 0x17f   :  { %1121 = vst.msk [vmem:[%s2343_s3 + $0x398] sm:$0xff] %vm179_vm4, %v637_v20 }
 0x180   :  { %v605_v21 = vpop.trf.xlu0 }
 0x181   :  { %1105 = vst.msk [vmem:[%s2343_s3 + $0x318] sm:$0xff] %vm179_vm4, %v605_v21 }
 0x182   :  { %v638_v22 = vpop.trf.xlu1 }
 0x183   :  { %1122 = vst.msk [vmem:[%s2343_s3 + $0x3a0] sm:$0xff] %vm179_vm4, %v638_v22 }
 0x184   :  { %v606_v23 = vpop.trf.xlu0 }
 0x185   :  { %1106 = vst.msk [vmem:[%s2343_s3 + $0x320] sm:$0xff] %vm179_vm4, %v606_v23 }
 0x186   :  { %v639_v24 = vpop.trf.xlu1 }
 0x187   :  { %1123 = vst.msk [vmem:[%s2343_s3 + $0x3a8] sm:$0xff] %vm179_vm4, %v639_v24 }
 0x188   :  { %v607_v27 = vpop.trf.xlu0 }
 0x189   :  { %1107 = vst.msk [vmem:[%s2343_s3 + $0x328] sm:$0xff] %vm179_vm4, %v607_v27 }
 0x18a   :  { %v640_v28 = vpop.trf.xlu1 }
 0x18b   :  { %1124 = vst.msk [vmem:[%s2343_s3 + $0x3b0] sm:$0xff] %vm179_vm4, %v640_v28 }
 0x18c   :  { %v608_v29 = vpop.trf.xlu0 }
 0x18d   :  { %1108 = vst.msk [vmem:[%s2343_s3 + $0x330] sm:$0xff] %vm179_vm4, %v608_v29 }
 0x18e   :  { %v641_v30 = vpop.trf.xlu1 }
 0x18f   :  { %1125 = vst.msk [vmem:[%s2343_s3 + $0x3b8] sm:$0xff] %vm179_vm4, %v641_v30 }
 0x190   :  { %v609_v31 = vpop.trf.xlu0 }
 0x191   :  { %1109 = vst.msk [vmem:[%s2343_s3 + $0x338] sm:$0xff] %vm179_vm4, %v609_v31 }
 0x192   :  { %v642_v34 = vpop.trf.xlu1 }
 0x193   :  { %1126 = vst.msk [vmem:[%s2343_s3 + $0x3c0] sm:$0xff] %vm179_vm4, %v642_v34 }
 0x194   :  { %v610_v35 = vpop.trf.xlu0 }
 0x195   :  { %1110 = vst.msk [vmem:[%s2343_s3 + $0x340] sm:$0xff] %vm179_vm4, %v610_v35 }
 0x196   :  { %v643_v36 = vpop.trf.xlu1 }
 0x197   :  { %1127 = vst.msk [vmem:[%s2343_s3 + $0x3c8] sm:$0xff] %vm179_vm4, %v643_v36 }
 0x198   :  { %v611_v37 = vpop.trf.xlu0 }
 0x199   :  { %1111 = vst.msk [vmem:[%s2343_s3 + $0x348] sm:$0xff] %vm179_vm4, %v611_v37 }
 0x19a   :  { %v644_v38 = vpop.trf.xlu1 }
 0x19b   :  { %1128 = vst.msk [vmem:[%s2343_s3 + $0x3d0] sm:$0xff] %vm179_vm4, %v644_v38 }
 0x19c   :  { %v612_v39 = vpop.trf.xlu0 }
 0x19d   :  { %1112 = vst.msk [vmem:[%s2343_s3 + $0x350] sm:$0xff] %vm179_vm4, %v612_v39 }
 0x19e   :  { %v645_v40 = vpop.trf.xlu1 }
 0x19f   :  { %1129 = vst.msk [vmem:[%s2343_s3 + $0x3d8] sm:$0xff] %vm179_vm4, %v645_v40 }
 0x1a0   :  { %v613_v41 = vpop.trf.xlu0 }
 0x1a1   :  { %1113 = vst.msk [vmem:[%s2343_s3 + $0x358] sm:$0xff] %vm179_vm4, %v613_v41 }
 0x1a2   :  { %v646_v42 = vpop.trf.xlu1 }
 0x1a3   :  { %1130 = vst.msk [vmem:[%s2343_s3 + $0x3e0] sm:$0xff] %vm179_vm4, %v646_v42 }
 0x1a4   :  { %v614_v43 = vpop.trf.xlu0 }
 0x1a5   :  { %1114 = vst.msk [vmem:[%s2343_s3 + $0x360] sm:$0xff] %vm179_vm4, %v614_v43 }
 0x1a6   :  { %v647_v44 = vpop.trf.xlu1 }
 0x1a7   :  { %1131 = vst.msk [vmem:[%s2343_s3 + $0x3e8] sm:$0xff] %vm179_vm4, %v647_v44 }
 0x1a8   :  { %v615_v45 = vpop.trf.xlu0 }
 0x1a9   :  { %1115 = vst.msk [vmem:[%s2343_s3 + $0x368] sm:$0xff] %vm179_vm4, %v615_v45 }
 0x1aa   :  { %v648_v46 = vpop.trf.xlu1 }
 0x1ab   :  { %1132 = vst.msk [vmem:[%s2343_s3 + $0x3f0] sm:$0xff] %vm179_vm4, %v648_v46 }
 0x1ac   :  { %v616_v47 = vpop.trf.xlu0 }
 0x1ad   :  { %1116 = vst.msk [vmem:[%s2343_s3 + $0x370] sm:$0xff] %vm179_vm4, %v616_v47 }
 0x1ae   :  { %v649_v48 = vpop.trf.xlu1 }
 0x1af   :  { %1133 = vst.msk [vmem:[%s2343_s3 + $0x3f8] sm:$0xff] %vm179_vm4, %v649_v48 }
 0x1b0   :  { %v617_v49 = vpop.trf.xlu0 }
 0x1b1   :  { %1117 = vst.msk [vmem:[%s2343_s3 + $0x378] sm:$0xff] %vm179_vm4, %v617_v49 }
 0x1b2   :  { %v791_v50 = vpop.trf.xlu1 }
 0x1b3   :  { %1160 = vst.msk [vmem:[%s2343_s3 + $0x480] sm:$0xff] %vm179_vm4, %v791_v50 }
 0x1b4   :  { %v759_v51 = vpop.trf.xlu0 }
 0x1b5   :  { %1144 = vst.msk [vmem:[%s2343_s3 + $0x400] sm:$0xff] %vm179_vm4, %v759_v51 }
 0x1b6   :  { %v792_v52 = vpop.trf.xlu1 }
 0x1b7   :  { %1161 = vst.msk [vmem:[%s2343_s3 + $0x488] sm:$0xff] %vm179_vm4, %v792_v52 }
 0x1b8   :  { %v760_v53 = vpop.trf.xlu0 }
 0x1b9   :  { %1145 = vst.msk [vmem:[%s2343_s3 + $0x408] sm:$0xff] %vm179_vm4, %v760_v53 }
 0x1ba   :  { %v793_v54 = vpop.trf.xlu1 }
 0x1bb   :  { %1162 = vst.msk [vmem:[%s2343_s3 + $0x490] sm:$0xff] %vm179_vm4, %v793_v54 }
 0x1bc   :  { %v761_v25 = vpop.trf.xlu0 }
 0x1bd   :  { %1146 = vst.msk [vmem:[%s2343_s3 + $0x410] sm:$0xff] %vm179_vm4, %v761_v25 }
 0x1be   :  { %v794_v26 = vpop.trf.xlu1 }
 0x1bf   :  { %1163 = vst.msk [vmem:[%s2343_s3 + $0x498] sm:$0xff] %vm179_vm4, %v794_v26 }
 0x1c0   :  { %v762_v55 = vpop.trf.xlu0 }
 0x1c1   :  { %1147 = vst.msk [vmem:[%s2343_s3 + $0x418] sm:$0xff] %vm179_vm4, %v762_v55 }
 0x1c2   :  { %v795_v56 = vpop.trf.xlu1 }
 0x1c3   :  { %1164 = vst.msk [vmem:[%s2343_s3 + $0x4a0] sm:$0xff] %vm179_vm4, %v795_v56 }
 0x1c4   :  { %v763_v32 = vpop.trf.xlu0 }
 0x1c5   :  { %1148 = vst.msk [vmem:[%s2343_s3 + $0x420] sm:$0xff] %vm179_vm4, %v763_v32 }
 0x1c6   :  { %v796_v57 = vpop.trf.xlu1 }
 0x1c7   :  { %1165 = vst.msk [vmem:[%s2343_s3 + $0x4a8] sm:$0xff] %vm179_vm4, %v796_v57 }
 0x1c8   :  { %v764_v33 = vpop.trf.xlu0 }
 0x1c9   :  { %1149 = vst.msk [vmem:[%s2343_s3 + $0x428] sm:$0xff] %vm179_vm4, %v764_v33 }
 0x1ca   :  { %v797_v58 = vpop.trf.xlu1 }
 0x1cb   :  { %1166 = vst.msk [vmem:[%s2343_s3 + $0x4b0] sm:$0xff] %vm179_vm4, %v797_v58 }
 0x1cc   :  { %v765_v59 = vpop.trf.xlu0 }
 0x1cd   :  { %1150 = vst.msk [vmem:[%s2343_s3 + $0x430] sm:$0xff] %vm179_vm4, %v765_v59 }
 0x1ce   :  { %v798_v60 = vpop.trf.xlu1 }
 0x1cf   :  { %1167 = vst.msk [vmem:[%s2343_s3 + $0x4b8] sm:$0xff] %vm179_vm4, %v798_v60 }
 0x1d0   :  { %v766_v61 = vpop.trf.xlu0 }
 0x1d1   :  { %1151 = vst.msk [vmem:[%s2343_s3 + $0x438] sm:$0xff] %vm179_vm4, %v766_v61 }
 0x1d2   :  { %v799_v62 = vpop.trf.xlu1 }
 0x1d3   :  { %1168 = vst.msk [vmem:[%s2343_s3 + $0x4c0] sm:$0xff] %vm179_vm4, %v799_v62 }
 0x1d4   :  { %v767_v63 = vpop.trf.xlu0 }
 0x1d5   :  { %1152 = vst.msk [vmem:[%s2343_s3 + $0x440] sm:$0xff] %vm179_vm4, %v767_v63 }
 0x1d6   :  { %v800_v0 = vpop.trf.xlu1 }
 0x1d7   :  { %1169 = vst.msk [vmem:[%s2343_s3 + $0x4c8] sm:$0xff] %vm179_vm4, %v800_v0 }
 0x1d8   :  { %v768_v1 = vpop.trf.xlu0 }
 0x1d9   :  { %1153 = vst.msk [vmem:[%s2343_s3 + $0x448] sm:$0xff] %vm179_vm4, %v768_v1 }
 0x1da   :  { %v801_v2 = vpop.trf.xlu1 }
 0x1db   :  { %1170 = vst.msk [vmem:[%s2343_s3 + $0x4d0] sm:$0xff] %vm179_vm4, %v801_v2 }
 0x1dc   :  { %v769_v3 = vpop.trf.xlu0 }
 0x1dd   :  { %1154 = vst.msk [vmem:[%s2343_s3 + $0x450] sm:$0xff] %vm179_vm4, %v769_v3 }
 0x1de   :  { %v802_v4 = vpop.trf.xlu1 }
 0x1df   :  { %1171 = vst.msk [vmem:[%s2343_s3 + $0x4d8] sm:$0xff] %vm179_vm4, %v802_v4 }
 0x1e0   :  { %v770_v5 = vpop.trf.xlu0 }
 0x1e1   :  { %1155 = vst.msk [vmem:[%s2343_s3 + $0x458] sm:$0xff] %vm179_vm4, %v770_v5 }
 0x1e2   :  { %v803_v6 = vpop.trf.xlu1 }
 0x1e3   :  { %1172 = vst.msk [vmem:[%s2343_s3 + $0x4e0] sm:$0xff] %vm179_vm4, %v803_v6 }
 0x1e4   :  { %v771_v7 = vpop.trf.xlu0 }
 0x1e5   :  { %1156 = vst.msk [vmem:[%s2343_s3 + $0x460] sm:$0xff] %vm179_vm4, %v771_v7 }
 0x1e6   :  { %v804_v8 = vpop.trf.xlu1 }
 0x1e7   :  { %1173 = vst.msk [vmem:[%s2343_s3 + $0x4e8] sm:$0xff] %vm179_vm4, %v804_v8 }
 0x1e8   :  { %v772_v9 = vpop.trf.xlu0 }
 0x1e9   :  { %1157 = vst.msk [vmem:[%s2343_s3 + $0x468] sm:$0xff] %vm179_vm4, %v772_v9 }
 0x1ea   :  { %v805_v10 = vpop.trf.xlu1 }
 0x1eb   :  { %1174 = vst.msk [vmem:[%s2343_s3 + $0x4f0] sm:$0xff] %vm179_vm4, %v805_v10 }
 0x1ec   :  { %v773_v11 = vpop.trf.xlu0 }
 0x1ed   :  { %1158 = vst.msk [vmem:[%s2343_s3 + $0x470] sm:$0xff] %vm179_vm4, %v773_v11 }
 0x1ee   :  { %v806_v12 = vpop.trf.xlu1 }
 0x1ef   :  { %1175 = vst.msk [vmem:[%s2343_s3 + $0x4f8] sm:$0xff] %vm179_vm4, %v806_v12 }
 0x1f0   :  { %v774_v13 = vpop.trf.xlu0 }
 0x1f1   :  { %1159 = vst.msk [vmem:[%s2343_s3 + $0x478] sm:$0xff] %vm179_vm4, %v774_v13 }
 0x1f2   :  { %v948_v14 = vpop.trf.xlu1 }
 0x1f3   :  { %1202 = vst.msk [vmem:[%s2343_s3 + $0x580] sm:$0xff] %vm179_vm4, %v948_v14 }
 0x1f4   :  { %v916_v15 = vpop.trf.xlu0 }
 0x1f5   :  { %1186 = vst.msk [vmem:[%s2343_s3 + $0x500] sm:$0xff] %vm179_vm4, %v916_v15 }
 0x1f6   :  { %v949_v16 = vpop.trf.xlu1 }
 0x1f7   :  { %1203 = vst.msk [vmem:[%s2343_s3 + $0x588] sm:$0xff] %vm179_vm4, %v949_v16 }
 0x1f8   :  { %v917_v17 = vpop.trf.xlu0 }
 0x1f9   :  { %1187 = vst.msk [vmem:[%s2343_s3 + $0x508] sm:$0xff] %vm179_vm4, %v917_v17 }
 0x1fa   :  { %v950_v18 = vpop.trf.xlu1 }
 0x1fb   :  { %1204 = vst.msk [vmem:[%s2343_s3 + $0x590] sm:$0xff] %vm179_vm4, %v950_v18 }
 0x1fc   :  { %v918_v19 = vpop.trf.xlu0 }
 0x1fd   :  { %1188 = vst.msk [vmem:[%s2343_s3 + $0x510] sm:$0xff] %vm179_vm4, %v918_v19 }
 0x1fe   :  { %v951_v20 = vpop.trf.xlu1 }
 0x1ff   :  { %1205 = vst.msk [vmem:[%s2343_s3 + $0x598] sm:$0xff] %vm179_vm4, %v951_v20 }
 0x200   :  { %v919_v21 = vpop.trf.xlu0 }
 0x201   :  { %1189 = vst.msk [vmem:[%s2343_s3 + $0x518] sm:$0xff] %vm179_vm4, %v919_v21 }
 0x202   :  { %v952_v22 = vpop.trf.xlu1 }
 0x203   :  { %1206 = vst.msk [vmem:[%s2343_s3 + $0x5a0] sm:$0xff] %vm179_vm4, %v952_v22 }
 0x204   :  { %v920_v23 = vpop.trf.xlu0 }
 0x205   :  { %1190 = vst.msk [vmem:[%s2343_s3 + $0x520] sm:$0xff] %vm179_vm4, %v920_v23 }
 0x206   :  { %v953_v24 = vpop.trf.xlu1 }
 0x207   :  { %1207 = vst.msk [vmem:[%s2343_s3 + $0x5a8] sm:$0xff] %vm179_vm4, %v953_v24 }
 0x208   :  { %v921_v27 = vpop.trf.xlu0 }
 0x209   :  { %1191 = vst.msk [vmem:[%s2343_s3 + $0x528] sm:$0xff] %vm179_vm4, %v921_v27 }
 0x20a   :  { %v954_v28 = vpop.trf.xlu1 }
 0x20b   :  { %1208 = vst.msk [vmem:[%s2343_s3 + $0x5b0] sm:$0xff] %vm179_vm4, %v954_v28 }
 0x20c   :  { %v922_v29 = vpop.trf.xlu0 }
 0x20d   :  { %1192 = vst.msk [vmem:[%s2343_s3 + $0x530] sm:$0xff] %vm179_vm4, %v922_v29 }
 0x20e   :  { %v955_v30 = vpop.trf.xlu1 }
 0x20f   :  { %1209 = vst.msk [vmem:[%s2343_s3 + $0x5b8] sm:$0xff] %vm179_vm4, %v955_v30 }
 0x210   :  { %v923_v31 = vpop.trf.xlu0 }
 0x211   :  { %1193 = vst.msk [vmem:[%s2343_s3 + $0x538] sm:$0xff] %vm179_vm4, %v923_v31 }
 0x212   :  { %v956_v34 = vpop.trf.xlu1 }
 0x213   :  { %1210 = vst.msk [vmem:[%s2343_s3 + $0x5c0] sm:$0xff] %vm179_vm4, %v956_v34 }
 0x214   :  { %v924_v35 = vpop.trf.xlu0 }
 0x215   :  { %1194 = vst.msk [vmem:[%s2343_s3 + $0x540] sm:$0xff] %vm179_vm4, %v924_v35 }
 0x216   :  { %v957_v36 = vpop.trf.xlu1 }
 0x217   :  { %1211 = vst.msk [vmem:[%s2343_s3 + $0x5c8] sm:$0xff] %vm179_vm4, %v957_v36 }
 0x218   :  { %v925_v37 = vpop.trf.xlu0 }
 0x219   :  { %1195 = vst.msk [vmem:[%s2343_s3 + $0x548] sm:$0xff] %vm179_vm4, %v925_v37 }
 0x21a   :  { %v958_v38 = vpop.trf.xlu1 }
 0x21b   :  { %1212 = vst.msk [vmem:[%s2343_s3 + $0x5d0] sm:$0xff] %vm179_vm4, %v958_v38 }
 0x21c   :  { %v926_v39 = vpop.trf.xlu0 }
 0x21d   :  { %1196 = vst.msk [vmem:[%s2343_s3 + $0x550] sm:$0xff] %vm179_vm4, %v926_v39 }
 0x21e   :  { %v959_v40 = vpop.trf.xlu1 }
 0x21f   :  { %1213 = vst.msk [vmem:[%s2343_s3 + $0x5d8] sm:$0xff] %vm179_vm4, %v959_v40 }
 0x220   :  { %v927_v41 = vpop.trf.xlu0 }
 0x221   :  { %1197 = vst.msk [vmem:[%s2343_s3 + $0x558] sm:$0xff] %vm179_vm4, %v927_v41 }
 0x222   :  { %v960_v42 = vpop.trf.xlu1 }
 0x223   :  { %1214 = vst.msk [vmem:[%s2343_s3 + $0x5e0] sm:$0xff] %vm179_vm4, %v960_v42 }
 0x224   :  { %v928_v43 = vpop.trf.xlu0 }
 0x225   :  { %1198 = vst.msk [vmem:[%s2343_s3 + $0x560] sm:$0xff] %vm179_vm4, %v928_v43 }
 0x226   :  { %v961_v44 = vpop.trf.xlu1 }
 0x227   :  { %1215 = vst.msk [vmem:[%s2343_s3 + $0x5e8] sm:$0xff] %vm179_vm4, %v961_v44 }
 0x228   :  { %v929_v45 = vpop.trf.xlu0 }
 0x229   :  { %1199 = vst.msk [vmem:[%s2343_s3 + $0x568] sm:$0xff] %vm179_vm4, %v929_v45 }
 0x22a   :  { %v962_v46 = vpop.trf.xlu1 }
 0x22b   :  { %1216 = vst.msk [vmem:[%s2343_s3 + $0x5f0] sm:$0xff] %vm179_vm4, %v962_v46 }
 0x22c   :  { %v930_v47 = vpop.trf.xlu0 }
 0x22d   :  { %1200 = vst.msk [vmem:[%s2343_s3 + $0x570] sm:$0xff] %vm179_vm4, %v930_v47 }
 0x22e   :  { %v963_v48 = vpop.trf.xlu1 }
 0x22f   :  { %1217 = vst.msk [vmem:[%s2343_s3 + $0x5f8] sm:$0xff] %vm179_vm4, %v963_v48 }
 0x230   :  { %v931_v49 = vpop.trf.xlu0 }
 0x231   :  { %1201 = vst.msk [vmem:[%s2343_s3 + $0x578] sm:$0xff] %vm179_vm4, %v931_v49 }
 0x232   :  { %1001 = vsyncpa [#allocation3], 1 }

</bundles_post_ra>
